<compile_context>
chip_gen: v7x
topology: tpu7x:2x2x1
jax: 0.10.0
libtpu: 0.0.40
codegen_flags: <defaults>
</compile_context>

<pallas_src>
import jax
import jax.numpy as jnp
import numpy as np
from jax.experimental import pallas as pl
from jax.experimental.pallas import tpu as pltpu


def _round_up(x, m):
    return ((x + m - 1) // m) * m


def _vmem_cap_bytes():
    """Physical VMEM minus ~1/8 headroom for Mosaic internal scratch.

    v5e/v6e: 128 MiB -> 112 MiB, v7x: 64 MiB -> 56 MiB.  Falls back to a
    conservative 56 MiB when the query is unavailable (e.g. interpret mode).
    """
    try:
        cap = int(pltpu.get_tpu_info().vmem_capacity_bytes)
        if cap > 0:
            return (cap * 7) // 8
    except Exception:
        pass
    return 56 * 1024 * 1024


# ---------------------------------------------------------------------------
# Kernel 1: all T message-passing steps fused into one pallas_call, grid=(T,).
# ---------------------------------------------------------------------------
def mp_fused_kernel(h0_ref, a_ref, deg_ref, c_ref, wu_ref, wm_ref, bm_ref, out_ref):
    """One grid step = one message-passing iteration k.

    The output BlockSpec has a constant block index, so out_ref stays resident in
    VMEM across all T steps and carries the node state h; HBM writeback happens
    only after the last step.  MXU operands are bf16 (A is a 0/1 mask -> exact);
    accumulation and the resident h state are fp32.
    """
    k = pl.program_id(0)

    # Seed the resident state from the (padded) input node features.
    @pl.when(k == 0)
    def _():
        out_ref[...] = h0_ref[...]

    h = out_ref[...]                                   # (Np, Dp) fp32, old h
    deg = deg_ref[...]                                 # (Np, 1)  fp32 node degrees
    h_bf = h.astype(jnp.bfloat16)

    # Neighbor feature sum: one MXU matmul over the dense adjacency (bf16 x bf16).
    h_nbr = jnp.dot(a_ref[...], h_bf, preferred_element_type=jnp.float32)   # (Np, Dp)

    # msg_v = sum_{w in g[v]} U_k([h_v, h_w, e_vw])
    #       = (deg_v * h_v) @ Wself^T + (A@H) @ Wnbr^T + c_k[v]
    # with c_k = e_sum @ Wedge^T + deg*bu precomputed in the wrapper, so K = 2*Dp.
    x = jnp.concatenate([(h * deg).astype(jnp.bfloat16),
                         h_nbr.astype(jnp.bfloat16)], axis=-1)              # (Np, 2*Dp)
    msg = jnp.dot(x, wu_ref[0], preferred_element_type=jnp.float32) + c_ref[0]

    # h_new = relu(M_k([h_v, msg_v]))
    y = jnp.concatenate([h_bf, msg.astype(jnp.bfloat16)], axis=-1)          # (Np, 2*Dp)
    upd = jnp.dot(y, wm_ref[0], preferred_element_type=jnp.float32) + bm_ref[0]
    out_ref[...] = jnp.maximum(upd, 0.0).astype(out_ref.dtype)


# ---------------------------------------------------------------------------
# Kernel 2: one message-passing step for a tile of node rows (large-N / v7x path;
# the row grid axis is "parallel" so it is sharded across both TensorCores).
# ---------------------------------------------------------------------------
def mp_rowtile_kernel(hfull_ref, htile_ref, a_ref, deg_ref, c_ref,
                      wu_ref, wm_ref, bm_ref, out_ref):
    h_full = hfull_ref[...].astype(jnp.bfloat16)                  # (Np, Dp)
    h_t = htile_ref[...]                                          # (tm, Dp) fp32
    deg_t = deg_ref[...]                                          # (tm, 1)
    h_nbr = jnp.dot(a_ref[...], h_full, preferred_element_type=jnp.float32)  # (tm, Dp)
    x = jnp.concatenate([(h_t * deg_t).astype(jnp.bfloat16),
                         h_nbr.astype(jnp.bfloat16)], axis=-1)
    msg = jnp.dot(x, wu_ref[...], preferred_element_type=jnp.float32) + c_ref[...]
    y = jnp.concatenate([h_t.astype(jnp.bfloat16), msg.astype(jnp.bfloat16)], axis=-1)
    upd = jnp.dot(y, wm_ref[...], preferred_element_type=jnp.float32) + bm_ref[...]
    out_ref[...] = jnp.maximum(upd, 0.0).astype(out_ref.dtype)


def message_passing_forward(A, E, H, params, *, force_path=None, row_tile=256):
    """Equivalent of MessagePassing.forward on the dense (A, E, H) graph layout.

    params: list of T tuples (W_Uk, b_Uk, W_Mk, b_Mk) with nn.Linear layouts.
    Returns ((A, E), new_node_features); edge features are unchanged.
    """
    N, D = H.shape
    De = E.shape[-1]
    T = len(params)

    Dp = _round_up(D, 128)          # lane-dense feature width
    Ku = 2 * Dp                     # [deg*h | A@h] -> exactly one 256-deep MXU pass
    Km = 2 * Dp                     # [h | msg]

    # ---- graph-invariant reductions, hoisted out of the T-step loop -------------
    A_f = A.astype(jnp.float32)
    deg = jnp.sum(A_f, axis=1, keepdims=True)                     # (N, 1)
    e_sum = jnp.einsum('vw,vwd->vd', A_f, E.astype(jnp.float32))  # (N, De); the big E
                                                                  # tensor never enters
                                                                  # the kernel
    vmem_cap = _vmem_cap_bytes()

    def fused_vmem_bytes(np_):
        # single-buffered invariants + double-buffered per-step blocks + resident
        # output + in-kernel temporaries (bf16 copies, concat operands, accumulators)
        return (np_ * Dp * 4 + np_ * np_ * 2 + np_ * 128 * 4
                + 2 * np_ * Dp * 4
                + 2 * (Ku + Km) * Dp * 2 + 2 * Dp * 4
                + 2 * np_ * Dp * 4
                + 26 * np_ * Dp)

    np8 = _round_up(N, 8)
    if force_path == "row_tiled":
        use_fused = False
    elif force_path == "fused":
        use_fused = True
    else:
        use_fused = fused_vmem_bytes(np8) <= vmem_cap

    if use_fused:
        Np = np8
        tm = Np
    else:
        tm = max(16, _round_up(int(row_tile), 16))   # bf16 row tile: multiple of 16
        Np = _round_up(N, tm)

    # ---- node padding: zero rows/cols are inert (their adjacency entries are 0) --
    A_p = jnp.zeros((Np, Np), jnp.bfloat16).at[:N, :N].set(A_f.astype(jnp.bfloat16))
    h0_p = jnp.zeros((Np, Dp), jnp.float32).at[:N, :D].set(H.astype(jnp.float32))
    deg_p = jnp.zeros((Np, 1), jnp.float32).at[:N, :].set(deg)

    # ---- per-step packed weights (lane-dense, bf16) + per-step constant c_k ------
    wu_s, wm_s, bm_s, c_s = [], [], [], []
    for (wu, bu, wm, bm) in params:
        wu = jnp.asarray(wu, jnp.float32); bu = jnp.asarray(bu, jnp.float32)
        wm = jnp.asarray(wm, jnp.float32); bm = jnp.asarray(bm, jnp.float32)
        wu_t, wm_t = wu.T, wm.T            # y = x @ W.T + b  (nn.Linear layout)
        wu_p = jnp.zeros((Ku, Dp), jnp.float32)
        wu_p = wu_p.at[0:D, 0:D].set(wu_t[0:D])              # self block (deg*h)
        wu_p = wu_p.at[Dp:Dp + D, 0:D].set(wu_t[D:2 * D])    # neighbor block (A@h)
        wm_p = jnp.zeros((Km, Dp), jnp.float32)
        wm_p = wm_p.at[0:D, 0:D].set(wm_t[0:D])              # self block (h)
        wm_p = wm_p.at[Dp:Dp + D, 0:D].set(wm_t[D:2 * D])    # message block (msg)
        # Edge + U-bias contribution is independent of h -> fold into c_k:
        #   c_k[v] = (sum_w A[v,w] e_vw) @ Wedge^T + deg(v) * bu
        c_k = e_sum @ wu_t[2 * D:2 * D + De] + deg * bu[None, :]          # (N, D)
        c_p = jnp.zeros((Np, Dp), jnp.float32).at[:N, :D].set(c_k)
        bm_p = jnp.zeros((1, Dp), jnp.float32).at[0, :D].set(bm)
        wu_s.append(wu_p.astype(jnp.bfloat16))
        wm_s.append(wm_p.astype(jnp.bfloat16))
        bm_s.append(bm_p)
        c_s.append(c_p)
    wu_s = jnp.stack(wu_s)      # (T, Ku, Dp) bf16
    wm_s = jnp.stack(wm_s)      # (T, Km, Dp) bf16
    bm_s = jnp.stack(bm_s)      # (T, 1, Dp)  fp32  (rank 3 -> matches BlockSpec rank)
    c_s = jnp.stack(c_s)        # (T, Np, Dp) fp32

    if use_fused:
        vmem_limit = int(min(max(2 * fused_vmem_bytes(Np), 32 * 1024 * 1024), vmem_cap))
        cost = pl.CostEstimate(
            flops=int(2 * T * (Np * Np * Dp + Np * Ku * Dp + Np * Km * Dp)),
            transcendentals=0,
            bytes_accessed=int(Np * Np * 2 + 2 * Np * Dp * 4 + Np * 4
                               + T * (Np * Dp * 4 + (Ku + Km) * Dp * 2 + Dp * 4)))

        def call(single_buffer):
            def invariant_spec(shape):
                # Graph-invariant blocks (constant index map) are DMA'd exactly once;
                # single-buffering them avoids a second VMEM copy of A, the dominant
                # O(N^2) term -- critical on v7x's 64 MiB VMEM.
                if single_buffer:
                    return pl.BlockSpec(shape, lambda k: (0,) * len(shape),
                                        pipeline_mode=pl.Buffered(buffer_count=1))
                return pl.BlockSpec(shape, lambda k: (0,) * len(shape))

            return pl.pallas_call(
                mp_fused_kernel,
                out_shape=jax.ShapeDtypeStruct((Np, Dp), jnp.float32),
                grid_spec=pltpu.PrefetchScalarGridSpec(
                    num_scalar_prefetch=0,
                    grid=(T,),                                        # sequential steps
                    in_specs=[
                        invariant_spec((Np, Dp)),                        # h0
                        invariant_spec((Np, Np)),                        # A (bf16 mask)
                        invariant_spec((Np, 1)),                         # deg
                        pl.BlockSpec((1, Np, Dp), lambda k: (k, 0, 0)),  # c_k
                        pl.BlockSpec((1, Ku, Dp), lambda k: (k, 0, 0)),  # U_k weight
                        pl.BlockSpec((1, Km, Dp), lambda k: (k, 0, 0)),  # M_k weight
                        pl.BlockSpec((1, 1, Dp), lambda k: (k, 0, 0)),   # M_k bias
                    ],
                    out_specs=pl.BlockSpec((Np, Dp), lambda k: (0, 0)),  # resident h
                ),
                compiler_params=pltpu.CompilerParams(
                    dimension_semantics=("arbitrary",),               # steps are serial
                    vmem_limit_bytes=vmem_limit,
                ),
                cost_estimate=cost,
            )(h0_p, A_p, deg_p, c_s, wu_s, wm_s, bm_s)

        try:
            h_out_p = call(single_buffer=True)
        except Exception:
            # BlockSpec(pipeline_mode=...) unsupported on this jax version / backend:
            # identical semantics with default double-buffering, just more VMEM.
            h_out_p = call(single_buffer=False)
    else:
        # Large-N / v7x path: one pallas_call per step, node rows tiled and marked
        # "parallel" so the grid is sharded across both TensorCores; h round-trips to
        # HBM once per step (cheap relative to the MXU-bound O(N^2*Dp) compute).
        grid_rows = Np // tm
        ws = (2 * Np * Dp * 4
              + 2 * (tm * Np * 2 + 3 * tm * Dp * 4 + tm * 128 * 4)
              + (Ku + Km) * Dp * 2 + Dp * 4 + 26 * tm * Dp)
        vmem_limit = int(min(max(2 * ws, 32 * 1024 * 1024), vmem_cap))
        h_cur = h0_p
        for k in range(T):
            h_cur = pl.pallas_call(
                mp_rowtile_kernel,
                out_shape=jax.ShapeDtypeStruct((Np, Dp), jnp.float32),
                grid_spec=pltpu.PrefetchScalarGridSpec(
                    num_scalar_prefetch=0,
                    grid=(grid_rows,),
                    in_specs=[
                        pl.BlockSpec((Np, Dp), lambda i: (0, 0)),     # full old h
                        pl.BlockSpec((tm, Dp), lambda i: (i, 0)),     # old h, row tile
                        pl.BlockSpec((tm, Np), lambda i: (i, 0)),     # A row tile
                        pl.BlockSpec((tm, 1), lambda i: (i, 0)),      # deg tile
                        pl.BlockSpec((tm, Dp), lambda i: (i, 0)),     # c_k tile
                        pl.BlockSpec((Ku, Dp), lambda i: (0, 0)),     # U_k weight
                        pl.BlockSpec((Km, Dp), lambda i: (0, 0)),     # M_k weight
                        pl.BlockSpec((1, Dp), lambda i: (0, 0)),      # M_k bias
                    ],
                    out_specs=pl.BlockSpec((tm, Dp), lambda i: (i, 0)),
                ),
                compiler_params=pltpu.CompilerParams(
                    dimension_semantics=("parallel",),                # both TCs (v7x)
                    vmem_limit_bytes=vmem_limit,
                ),
            )(h_cur, h_cur, A_p, deg_p, c_s[k], wu_s[k], wm_s[k], bm_s[k])
        h_out_p = h_cur

    return (A, E), h_out_p[:N, :D]


# ---------------------------------------------------------------------------
# Literal per-node / per-neighbor reference mirroring the PyTorch loops
# (numpy, used only to validate the kernels).
# ---------------------------------------------------------------------------
def ref_forward_numpy(adj, E, H, params):
    h = np.asarray(H, np.float64)
    E = np.asarray(E, np.float64)
    N, D = h.shape
    for (wu, bu, wm, bm) in params:
        wu = np.asarray(wu, np.float64); bu = np.asarray(bu, np.float64)
        wm = np.asarray(wm, np.float64); bm = np.asarray(bm, np.float64)
        msgs = np.zeros((N, D), np.float64)
        for v in range(N):
            acc = None
            for w in range(N):
                if adj[v, w] > 0:
                    x = np.concatenate([h[v], h[w], E[v, w]])
                    m = x @ wu.T + bu
                    acc = m if acc is None else acc + m
            msgs[v] = acc            # test graph: every node has >= 1 neighbor
        h = np.maximum(np.concatenate([h, msgs], axis=1) @ wm.T + bm, 0.0)
    return h


if __name__ == "__main__":
    node_dim, edge_dim, T = 32, 16, 3      # module defines U_0..U_2 / M_0..M_2
    N = 24                                 # graph nodes

    key = jax.random.PRNGKey(0)
    keys = jax.random.split(key, 2 + 4 * T)

    # Ring graph: every node has exactly two neighbors (PyTorch reference needs >= 1).
    adj_np = np.zeros((N, N), np.float32)
    for v in range(N):
        adj_np[v, (v + 1) % N] = 1.0
        adj_np[v, (v - 1) % N] = 1.0
    A = jnp.asarray(adj_np)

    H0 = jax.random.normal(keys[0], (N, node_dim), jnp.float32)
    E = jax.random.normal(keys[1], (N, N, edge_dim), jnp.float32)

    # Deterministic synthetic parameters (nn.Linear shapes from __init__).
    params = []
    for k in range(T):
        wu = 0.1 * jax.random.normal(keys[2 + 4 * k], (node_dim, 2 * node_dim + edge_dim), jnp.float32)
        bu = 0.1 * jax.random.normal(keys[3 + 4 * k], (node_dim,), jnp.float32)
        wm = 0.1 * jax.random.normal(keys[4 + 4 * k], (node_dim, 2 * node_dim), jnp.float32)
        bm = 0.1 * jax.random.normal(keys[5 + 4 * k], (node_dim,), jnp.float32)
        params.append((wu, bu, wm, bm))

    h_ref = ref_forward_numpy(adj_np, np.asarray(E), np.asarray(H0),
                              [tuple(np.asarray(p) for p in ps) for ps in params])

    # Tolerance accounts for bf16 MXU operands (accumulation stays fp32).
    rtol = atol = 5e-2

    # 1) Fused single-call path (h resident in VMEM across all T steps).
    (_, _), h_fused = message_passing_forward(A, E, H0, params)
    h_fused = np.asarray(jax.block_until_ready(h_fused))
    assert np.allclose(h_fused, h_ref, rtol=rtol, atol=atol), \
        float(np.max(np.abs(h_fused - h_ref)))

    # 2) Row-tiled per-step path (large-N / v7x two-TensorCore variant).
    (_, _), h_tiled = message_passing_forward(A, E, H0, params,
                                              force_path="row_tiled", row_tile=16)
    h_tiled = np.asarray(jax.block_until_ready(h_tiled))
    assert np.allclose(h_tiled, h_ref, rtol=rtol, atol=atol), \
        float(np.max(np.abs(h_tiled - h_ref)))

    print("KERNEL_OK")
</pallas_src>

<mosaic_0001>
module attributes {stable_mosaic.version = 11 : i64} {
  func.func @mp_fused_kernel(%arg0: i32, %arg1: memref<24x128xf32, #tpu.memory_space<vmem>>, %arg2: memref<24x24xbf16, #tpu.memory_space<vmem>>, %arg3: memref<24x1xf32, #tpu.memory_space<vmem>>, %arg4: memref<1x24x128xf32, #tpu.memory_space<vmem>>, %arg5: memref<1x256x128xbf16, #tpu.memory_space<vmem>>, %arg6: memref<1x256x128xbf16, #tpu.memory_space<vmem>>, %arg7: memref<1x1x128xf32, #tpu.memory_space<vmem>>, %arg8: memref<24x128xf32, #tpu.memory_space<vmem>>) attributes {dimension_semantics = [#tpu.dimension_semantics<arbitrary>], iteration_bounds = array<i64: 3>, scalar_prefetch = 0 : i64, scratch_operands = 0 : i64, tpu.core_type = #tpu.core_type<tc>, window_params = [{pipeline_mode = #tpu.pipeline_mode<synchronous>, transform_indices = @transform_0, window_bounds = array<i64: 24, 128>}, {pipeline_mode = #tpu.pipeline_mode<synchronous>, transform_indices = @transform_1, window_bounds = array<i64: 24, 24>}, {pipeline_mode = #tpu.pipeline_mode<synchronous>, transform_indices = @transform_2, window_bounds = array<i64: 24, 1>}, {transform_indices = @transform_3, window_bounds = array<i64: 1, 24, 128>}, {transform_indices = @transform_4, window_bounds = array<i64: 1, 256, 128>}, {transform_indices = @transform_5, window_bounds = array<i64: 1, 256, 128>}, {transform_indices = @transform_6, window_bounds = array<i64: 1, 1, 128>}, {pipeline_mode = #tpu.pipeline_mode<synchronous>, transform_indices = @transform_7, window_bounds = array<i64: 24, 128>}]} {
    %c0_i32 = arith.constant 0 : i32
    %0 = arith.cmpi eq, %arg0, %c0_i32 : i32
    %1 = arith.extui %0 : i1 to i32
    %c0_i32_0 = arith.constant 0 : i32
    %2 = arith.cmpi ne, %1, %c0_i32_0 : i32
    scf.if %2 {
      %c0_23 = arith.constant 0 : index
      %c0_24 = arith.constant 0 : index
      %31 = vector.load %arg1[%c0_23, %c0_24] : memref<24x128xf32, #tpu.memory_space<vmem>>, vector<24x128xf32>
      %c0_25 = arith.constant 0 : index
      %c0_26 = arith.constant 0 : index
      %32 = vector.load %arg8[%c0_25, %c0_26] : memref<24x128xf32, #tpu.memory_space<vmem>>, vector<24x128xf32>
      tpu.vector_store %arg8[%c0_25, %c0_26], %31 {strides = array<i32>} : memref<24x128xf32, #tpu.memory_space<vmem>>, vector<24x128xf32>,
    } else {
    }
    %c0 = arith.constant 0 : index
    %c0_1 = arith.constant 0 : index
    %3 = vector.load %arg8[%c0, %c0_1] : memref<24x128xf32, #tpu.memory_space<vmem>>, vector<24x128xf32>
    %c0_2 = arith.constant 0 : index
    %c0_3 = arith.constant 0 : index
    %4 = vector.load %arg3[%c0_2, %c0_3] : memref<24x1xf32, #tpu.memory_space<vmem>>, vector<24x1xf32>
    %5 = arith.truncf %3 : vector<24x128xf32> to vector<24x128xbf16>
    %c0_4 = arith.constant 0 : index
    %c0_5 = arith.constant 0 : index
    %6 = vector.load %arg2[%c0_4, %c0_5] : memref<24x24xbf16, #tpu.memory_space<vmem>>, vector<24x24xbf16>
    %cst = arith.constant dense<0.000000e+00> : vector<24x128xf32>
    %7 = tpu.matmul %6, %5, %cst {dimension_numbers = #tpu.dot_dimension_numbers<[1], [0], [0], [1], [0, 0, 1, 1], [], []>} : vector<24x24xbf16>, vector<24x128xbf16>, vector<24x128xf32> -> vector<24x128xf32>
    %8 = vector.broadcast %4 : vector<24x1xf32> to vector<24x128xf32>
    %9 = arith.mulf %3, %8 : vector<24x128xf32>
    %10 = arith.truncf %9 : vector<24x128xf32> to vector<24x128xbf16>
    %11 = arith.truncf %7 : vector<24x128xf32> to vector<24x128xbf16>
    %12 = tpu.concatenate %10, %11 in 1 : vector<24x128xbf16>, vector<24x128xbf16> -> vector<24x256xbf16>
    %c0_6 = arith.constant 0 : index
    %c0_7 = arith.constant 0 : index
    %c0_8 = arith.constant 0 : index
    %13 = vector.load %arg5[%c0_6, %c0_7, %c0_8] : memref<1x256x128xbf16, #tpu.memory_space<vmem>>, vector<1x256x128xbf16>
    %14 = vector.shape_cast %13 : vector<1x256x128xbf16> to vector<256x128xbf16>
    %cst_9 = arith.constant dense<0.000000e+00> : vector<24x128xf32>
    %15 = tpu.matmul %12, %14, %cst_9 {dimension_numbers = #tpu.dot_dimension_numbers<[1], [0], [0], [1], [0, 0, 1, 1], [], []>} : vector<24x256xbf16>, vector<256x128xbf16>, vector<24x128xf32> -> vector<24x128xf32>
    %c0_10 = arith.constant 0 : index
    %c0_11 = arith.constant 0 : index
    %c0_12 = arith.constant 0 : index
    %16 = vector.load %arg4[%c0_10, %c0_11, %c0_12] : memref<1x24x128xf32, #tpu.memory_space<vmem>>, vector<1x24x128xf32>
    %17 = vector.shape_cast %16 : vector<1x24x128xf32> to vector<24x128xf32>
    %18 = arith.addf %15, %17 : vector<24x128xf32>
    %19 = arith.truncf %18 : vector<24x128xf32> to vector<24x128xbf16>
    %20 = tpu.concatenate %5, %19 in 1 : vector<24x128xbf16>, vector<24x128xbf16> -> vector<24x256xbf16>
    %c0_13 = arith.constant 0 : index
    %c0_14 = arith.constant 0 : index
    %c0_15 = arith.constant 0 : index
    %21 = vector.load %arg6[%c0_13, %c0_14, %c0_15] : memref<1x256x128xbf16, #tpu.memory_space<vmem>>, vector<1x256x128xbf16>
    %22 = vector.shape_cast %21 : vector<1x256x128xbf16> to vector<256x128xbf16>
    %cst_16 = arith.constant dense<0.000000e+00> : vector<24x128xf32>
    %23 = tpu.matmul %20, %22, %cst_16 {dimension_numbers = #tpu.dot_dimension_numbers<[1], [0], [0], [1], [0, 0, 1, 1], [], []>} : vector<24x256xbf16>, vector<256x128xbf16>, vector<24x128xf32> -> vector<24x128xf32>
    %c0_17 = arith.constant 0 : index
    %c0_18 = arith.constant 0 : index
    %c0_19 = arith.constant 0 : index
    %24 = vector.load %arg7[%c0_17, %c0_18, %c0_19] : memref<1x1x128xf32, #tpu.memory_space<vmem>>, vector<1x1x128xf32>
    %25 = vector.shape_cast %24 : vector<1x1x128xf32> to vector<1x128xf32>
    %26 = vector.broadcast %25 : vector<1x128xf32> to vector<24x128xf32>
    %27 = arith.addf %23, %26 : vector<24x128xf32>
    %cst_20 = arith.constant 0.000000e+00 : f32
    %28 = vector.broadcast %cst_20 : f32 to vector<24x128xf32>
    %29 = arith.maximumf %27, %28 : vector<24x128xf32>
    %c0_21 = arith.constant 0 : index
    %c0_22 = arith.constant 0 : index
    %30 = vector.load %arg8[%c0_21, %c0_22] : memref<24x128xf32, #tpu.memory_space<vmem>>, vector<24x128xf32>
    tpu.vector_store %arg8[%c0_21, %c0_22], %29 {strides = array<i32>} : memref<24x128xf32, #tpu.memory_space<vmem>>, vector<24x128xf32>,
    return
  }
  func.func @transform_0(%arg0: i32) -> (i32, i32) {
    %c0_i32 = arith.constant 0 : i32
    %c0_i32_0 = arith.constant 0 : i32
    %c0_i32_1 = arith.constant 0 : i32
    return %c0_i32, %c0_i32_0 : i32, i32
  }
  func.func @transform_1(%arg0: i32) -> (i32, i32) {
    %c0_i32 = arith.constant 0 : i32
    %c0_i32_0 = arith.constant 0 : i32
    %c0_i32_1 = arith.constant 0 : i32
    return %c0_i32, %c0_i32_0 : i32, i32
  }
  func.func @transform_2(%arg0: i32) -> (i32, i32) {
    %c0_i32 = arith.constant 0 : i32
    %c0_i32_0 = arith.constant 0 : i32
    %c0_i32_1 = arith.constant 0 : i32
    return %c0_i32, %c0_i32_0 : i32, i32
  }
  func.func @transform_3(%arg0: i32) -> (i32, i32, i32) {
    %c0_i32 = arith.constant 0 : i32
    %c0_i32_0 = arith.constant 0 : i32
    %c0_i32_1 = arith.constant 0 : i32
    return %arg0, %c0_i32, %c0_i32_0 : i32, i32, i32
  }
  func.func @transform_4(%arg0: i32) -> (i32, i32, i32) {
    %c0_i32 = arith.constant 0 : i32
    %c0_i32_0 = arith.constant 0 : i32
    %c0_i32_1 = arith.constant 0 : i32
    return %arg0, %c0_i32, %c0_i32_0 : i32, i32, i32
  }
  func.func @transform_5(%arg0: i32) -> (i32, i32, i32) {
    %c0_i32 = arith.constant 0 : i32
    %c0_i32_0 = arith.constant 0 : i32
    %c0_i32_1 = arith.constant 0 : i32
    return %arg0, %c0_i32, %c0_i32_0 : i32, i32, i32
  }
  func.func @transform_6(%arg0: i32) -> (i32, i32, i32) {
    %c0_i32 = arith.constant 0 : i32
    %c0_i32_0 = arith.constant 0 : i32
    %c0_i32_1 = arith.constant 0 : i32
    return %arg0, %c0_i32, %c0_i32_0 : i32, i32, i32
  }
  func.func @transform_7(%arg0: i32) -> (i32, i32) {
    %c0_i32 = arith.constant 0 : i32
    %c0_i32_0 = arith.constant 0 : i32
    %c0_i32_1 = arith.constant 0 : i32
    return %c0_i32, %c0_i32_0 : i32, i32
  }
}

module attributes {stable_mosaic.version = 11 : i64} {
  func.func @mp_fused_kernel(%arg0: i32, %arg1: memref<24x128xf32, #tpu.memory_space<vmem>>, %arg2: memref<24x24xbf16, #tpu.memory_space<vmem>>, %arg3: memref<24x1xf32, #tpu.memory_space<vmem>>, %arg4: memref<1x24x128xf32, #tpu.memory_space<vmem>>, %arg5: memref<1x256x128xbf16, #tpu.memory_space<vmem>>, %arg6: memref<1x256x128xbf16, #tpu.memory_space<vmem>>, %arg7: memref<1x1x128xf32, #tpu.memory_space<vmem>>, %arg8: memref<24x128xf32, #tpu.memory_space<vmem>>) attributes {dimension_semantics = [#tpu.dimension_semantics<arbitrary>], iteration_bounds = array<i64: 3>, scalar_prefetch = 0 : i64, scratch_operands = 0 : i64, tpu.core_type = #tpu.core_type<tc>, window_params = [{pipeline_mode = #tpu.pipeline_mode<synchronous>, transform_indices = @transform_0, window_bounds = array<i64: 24, 128>}, {pipeline_mode = #tpu.pipeline_mode<synchronous>, transform_indices = @transform_1, window_bounds = array<i64: 24, 24>}, {pipeline_mode = #tpu.pipeline_mode<synchronous>, transform_indices = @transform_2, window_bounds = array<i64: 24, 1>}, {transform_indices = @transform_3, window_bounds = array<i64: 1, 24, 128>}, {transform_indices = @transform_4, window_bounds = array<i64: 1, 256, 128>}, {transform_indices = @transform_5, window_bounds = array<i64: 1, 256, 128>}, {transform_indices = @transform_6, window_bounds = array<i64: 1, 1, 128>}, {pipeline_mode = #tpu.pipeline_mode<synchronous>, transform_indices = @transform_7, window_bounds = array<i64: 24, 128>}]} {
    %c0_i32 = arith.constant 0 : i32
    %0 = arith.cmpi eq, %arg0, %c0_i32 : i32
    %1 = arith.extui %0 : i1 to i32
    %c0_i32_0 = arith.constant 0 : i32
    %2 = arith.cmpi ne, %1, %c0_i32_0 : i32
    scf.if %2 {
      %c0_23 = arith.constant 0 : index
      %c0_24 = arith.constant 0 : index
      %31 = vector.load %arg1[%c0_23, %c0_24] : memref<24x128xf32, #tpu.memory_space<vmem>>, vector<24x128xf32>
      %c0_25 = arith.constant 0 : index
      %c0_26 = arith.constant 0 : index
      %32 = vector.load %arg8[%c0_25, %c0_26] : memref<24x128xf32, #tpu.memory_space<vmem>>, vector<24x128xf32>
      tpu.vector_store %arg8[%c0_25, %c0_26], %31 {strides = array<i32>} : memref<24x128xf32, #tpu.memory_space<vmem>>, vector<24x128xf32>,
    } else {
    }
    %c0 = arith.constant 0 : index
    %c0_1 = arith.constant 0 : index
    %3 = vector.load %arg8[%c0, %c0_1] : memref<24x128xf32, #tpu.memory_space<vmem>>, vector<24x128xf32>
    %c0_2 = arith.constant 0 : index
    %c0_3 = arith.constant 0 : index
    %4 = vector.load %arg3[%c0_2, %c0_3] : memref<24x1xf32, #tpu.memory_space<vmem>>, vector<24x1xf32>
    %5 = arith.truncf %3 : vector<24x128xf32> to vector<24x128xbf16>
    %c0_4 = arith.constant 0 : index
    %c0_5 = arith.constant 0 : index
    %6 = vector.load %arg2[%c0_4, %c0_5] : memref<24x24xbf16, #tpu.memory_space<vmem>>, vector<24x24xbf16>
    %cst = arith.constant dense<0.000000e+00> : vector<24x128xf32>
    %7 = tpu.matmul %6, %5, %cst {dimension_numbers = #tpu.dot_dimension_numbers<[1], [0], [0], [1], [0, 0, 1, 1], [], []>} : vector<24x24xbf16>, vector<24x128xbf16>, vector<24x128xf32> -> vector<24x128xf32>
    %8 = vector.broadcast %4 : vector<24x1xf32> to vector<24x128xf32>
    %9 = arith.mulf %3, %8 : vector<24x128xf32>
    %10 = arith.truncf %9 : vector<24x128xf32> to vector<24x128xbf16>
    %11 = arith.truncf %7 : vector<24x128xf32> to vector<24x128xbf16>
    %12 = tpu.concatenate %10, %11 in 1 : vector<24x128xbf16>, vector<24x128xbf16> -> vector<24x256xbf16>
    %c0_6 = arith.constant 0 : index
    %c0_7 = arith.constant 0 : index
    %c0_8 = arith.constant 0 : index
    %13 = vector.load %arg5[%c0_6, %c0_7, %c0_8] : memref<1x256x128xbf16, #tpu.memory_space<vmem>>, vector<1x256x128xbf16>
    %14 = vector.shape_cast %13 : vector<1x256x128xbf16> to vector<256x128xbf16>
    %cst_9 = arith.constant dense<0.000000e+00> : vector<24x128xf32>
    %15 = tpu.matmul %12, %14, %cst_9 {dimension_numbers = #tpu.dot_dimension_numbers<[1], [0], [0], [1], [0, 0, 1, 1], [], []>} : vector<24x256xbf16>, vector<256x128xbf16>, vector<24x128xf32> -> vector<24x128xf32>
    %c0_10 = arith.constant 0 : index
    %c0_11 = arith.constant 0 : index
    %c0_12 = arith.constant 0 : index
    %16 = vector.load %arg4[%c0_10, %c0_11, %c0_12] : memref<1x24x128xf32, #tpu.memory_space<vmem>>, vector<1x24x128xf32>
    %17 = vector.shape_cast %16 : vector<1x24x128xf32> to vector<24x128xf32>
    %18 = arith.addf %15, %17 : vector<24x128xf32>
    %19 = arith.truncf %18 : vector<24x128xf32> to vector<24x128xbf16>
    %20 = tpu.concatenate %5, %19 in 1 : vector<24x128xbf16>, vector<24x128xbf16> -> vector<24x256xbf16>
    %c0_13 = arith.constant 0 : index
    %c0_14 = arith.constant 0 : index
    %c0_15 = arith.constant 0 : index
    %21 = vector.load %arg6[%c0_13, %c0_14, %c0_15] : memref<1x256x128xbf16, #tpu.memory_space<vmem>>, vector<1x256x128xbf16>
    %22 = vector.shape_cast %21 : vector<1x256x128xbf16> to vector<256x128xbf16>
    %cst_16 = arith.constant dense<0.000000e+00> : vector<24x128xf32>
    %23 = tpu.matmul %20, %22, %cst_16 {dimension_numbers = #tpu.dot_dimension_numbers<[1], [0], [0], [1], [0, 0, 1, 1], [], []>} : vector<24x256xbf16>, vector<256x128xbf16>, vector<24x128xf32> -> vector<24x128xf32>
    %c0_17 = arith.constant 0 : index
    %c0_18 = arith.constant 0 : index
    %c0_19 = arith.constant 0 : index
    %24 = vector.load %arg7[%c0_17, %c0_18, %c0_19] : memref<1x1x128xf32, #tpu.memory_space<vmem>>, vector<1x1x128xf32>
    %25 = vector.shape_cast %24 : vector<1x1x128xf32> to vector<1x128xf32>
    %26 = vector.broadcast %25 : vector<1x128xf32> to vector<24x128xf32>
    %27 = arith.addf %23, %26 : vector<24x128xf32>
    %cst_20 = arith.constant 0.000000e+00 : f32
    %28 = vector.broadcast %cst_20 : f32 to vector<24x128xf32>
    %29 = arith.maximumf %27, %28 : vector<24x128xf32>
    %c0_21 = arith.constant 0 : index
    %c0_22 = arith.constant 0 : index
    %30 = vector.load %arg8[%c0_21, %c0_22] : memref<24x128xf32, #tpu.memory_space<vmem>>, vector<24x128xf32>
    tpu.vector_store %arg8[%c0_21, %c0_22], %29 {strides = array<i32>} : memref<24x128xf32, #tpu.memory_space<vmem>>, vector<24x128xf32>,
    return
  }
  func.func @transform_0(%arg0: i32) -> (i32, i32) {
    %c0_i32 = arith.constant 0 : i32
    %c0_i32_0 = arith.constant 0 : i32
    %c0_i32_1 = arith.constant 0 : i32
    return %c0_i32, %c0_i32_0 : i32, i32
  }
  func.func @transform_1(%arg0: i32) -> (i32, i32) {
    %c0_i32 = arith.constant 0 : i32
    %c0_i32_0 = arith.constant 0 : i32
    %c0_i32_1 = arith.constant 0 : i32
    return %c0_i32, %c0_i32_0 : i32, i32
  }
  func.func @transform_2(%arg0: i32) -> (i32, i32) {
    %c0_i32 = arith.constant 0 : i32
    %c0_i32_0 = arith.constant 0 : i32
    %c0_i32_1 = arith.constant 0 : i32
    return %c0_i32, %c0_i32_0 : i32, i32
  }
  func.func @transform_3(%arg0: i32) -> (i32, i32, i32) {
    %c0_i32 = arith.constant 0 : i32
    %c0_i32_0 = arith.constant 0 : i32
    %c0_i32_1 = arith.constant 0 : i32
    return %arg0, %c0_i32, %c0_i32_0 : i32, i32, i32
  }
  func.func @transform_4(%arg0: i32) -> (i32, i32, i32) {
    %c0_i32 = arith.constant 0 : i32
    %c0_i32_0 = arith.constant 0 : i32
    %c0_i32_1 = arith.constant 0 : i32
    return %arg0, %c0_i32, %c0_i32_0 : i32, i32, i32
  }
  func.func @transform_5(%arg0: i32) -> (i32, i32, i32) {
    %c0_i32 = arith.constant 0 : i32
    %c0_i32_0 = arith.constant 0 : i32
    %c0_i32_1 = arith.constant 0 : i32
    return %arg0, %c0_i32, %c0_i32_0 : i32, i32, i32
  }
  func.func @transform_6(%arg0: i32) -> (i32, i32, i32) {
    %c0_i32 = arith.constant 0 : i32
    %c0_i32_0 = arith.constant 0 : i32
    %c0_i32_1 = arith.constant 0 : i32
    return %arg0, %c0_i32, %c0_i32_0 : i32, i32, i32
  }
  func.func @transform_7(%arg0: i32) -> (i32, i32) {
    %c0_i32 = arith.constant 0 : i32
    %c0_i32_0 = arith.constant 0 : i32
    %c0_i32_1 = arith.constant 0 : i32
    return %c0_i32, %c0_i32_0 : i32, i32
  }
}

</mosaic_0001>

<bundles_post_ra>
// kernel: tpu_custom_call.1
= control target key start
LH: loop header
LB: loop body
LE: loop exit
PB: predicated region body
PF: predicated region fallthrough
CT: control target
= control target key end

     0   :  { %s1840_s0 = inlined_call_operand.vmem [shape: f32[24,128], index: 0, kind: input, shape index: {}]   ;;  %s1841_s1 = inlined_call_operand.hbm [shape: bf16[24,24], index: 1, kind: input, shape index: {}]   ;;  %s1842_s2 = inlined_call_operand.vmem [shape: f32[24,1], index: 2, kind: input, shape index: {}]   ;;  %s1843_s3 = inlined_call_operand.hbm [shape: f32[3,24,128], index: 3, kind: input, shape index: {}]   ;;  %s1844_s4 = inlined_call_operand.hbm [shape: bf16[3,256,128], index: 4, kind: input, shape index: {}]   ;;  %s1845_s5 = inlined_call_operand.hbm [shape: bf16[3,256,128], index: 5, kind: input, shape index: {}]   ;;  %s1846_s6 = inlined_call_operand.vmem [shape: f32[3,1,128], index: 6, kind: input, shape index: {}]   ;;  %s1847_s7 = inlined_call_operand.hbm [shape: f32[24,128], index: 7, kind: output, shape index: {}]  }
   0x1   :  { %1858 = sst [smem:[#allocation17_spill]] %s1843_s3 }
   0x2   :  { %12 = vsyncpa [#allocation3], 0 }
   0x3   :  { %13 = vsyncpa [#allocation6], 0 }
   0x4   :  { %15 = vsyncpa [#allocation6 + $0x1], 0 }
   0x5   :  { %16 = vsyncpa [#allocation9], 0 }
   0x6   :  { %18 = vsyncpa [#allocation9 + $0x1], 0 }
   0x7   :  { %19 = vsyncpa [#allocation4], 0  ;;  %s1480_s24 = smov 0   ;;  %s1482_s25 = smov 0  }
   0x8   :  { %s1484_s26 = smov 0   ;;  %s1486_s27 = smov 0  }
   0x9 LB: > { %1859 = sst [smem:[#allocation15_spill]] %s1422_s26  ;;  %s1501_s28 = sadd.s32 1, %s1426_s27   ;;  %s1426_s27 = sphi %s1486_s27, %s1880_s27   ;;  %s1422_s26 = sphi %s1484_s26, %s1877_s26   ;;  %s1418_s25 = sphi %s1482_s25, %s1879_s25   ;;  %s1414_s24 = sphi %s1480_s24, %s1878_s24  }
   0xa   : > { %s95_s29 = sadd.s32 1, %s1422_s26  ;;  %s92_s30 = ssub.s32 %s1426_s27, %s1501_s28 }
   0xb   : > { %p102_p0 = scmp.ne.s32.totalorder %s1422_s26, %s1418_s25  ;;  %p93_p1 = scmp.eq.s32.totalorder %s92_s30, 0 }
   0xc   : > { %p103_p2 = scmp.eq.s32.totalorder %s1426_s27, 0  ;;  %p1155_p3 = scmp.lt.s32.totalorder %s1426_s27, 3 }
   0xd   : > { %s1511_s8 = scalar_select %p93_p1, %s1422_s26, %s95_s29  }
   0xe   : > { %p104_p4 = por %p103_p2, %p102_p0  ;;  %s250_s9 = sand.u32 1, %s1426_s27  }
   0xf   : > { %1860 = sst [smem:[#allocation16_spill]] %s1511_s8  ;;  %s1515_s10 = sand.u32 1, %s1422_s26  }
  0x10   : > { %s1123_s11 = smul.u32 24, %s1515_s10  ;;  %p1518_p5 = pnand %p1155_p3, %p104_p4 }
  0x11   : > { %s1124_s13 = smul.u32 384, %s1426_s27  ;;  %s1862_s3 = sld [smem:[#allocation17_spill]] }
  0x12   : > { %s1861_s12 = scalar_select %p1518_p5, 1, 0 }
  0x13   : > { %s254_s17 = scalar_lea.vmem [#allocation5], %s1123_s11  ;;  %s1530_s19 = scalar_lea.sflag [#allocation6], %s250_s9 }
  0x14   : > { %s261_s18 = sshll.u32 %s254_s17, 4  ;;  %p1536_p7 = pneg %p1518_p5  ;;  %s1528_s18 = int_to_ptr.vmem [resolvable:$true] %s261_s18 }
  0x16   : > { %s1863_s21 = scalar_select %p1536_p7, 1, 0 }
  0x17   : > { %s1526_s16 = scalar_lea.hbm %s1862_s3, %s1124_s13  ;;  %s1241_s29 = scalar_lea.hbm %s1862_s3, 1152 }
  0x18   : > { %s1236_s20 = scalar_lea.hbm %s1526_s16, 384  ;;  %p1242_p10 = scmp.lt.u32.totalorder %s1526_s16, %s1862_s3 }
  0x19   : > { %p1237_p6 = scmp.ne.s32.totalorder %s1526_s16, %s1236_s20  ;;  %p1243_p11 = scmp.lt.u32.totalorder %s1241_s29, %s1236_s20 }
  0x1a   : > { %p1245_p13 = scmp.lt.u32.totalorder %s1236_s20, %s1526_s16 }
  0x1b   : > { %p1239_p8 = pnand %p1536_p7, %p1237_p6  ;;  %p1244_p12 = por %p1243_p11, %p1242_p10 }
  0x1d   : > { %p1240_p9 = pneg %p1239_p8  ;;  %p1246_p0 = por %p1245_p13, %p1244_p12 }
  0x1f   : > { %p1247_p1 = pnand %p1246_p0, %p1240_p9 }
  0x21   : > { %1250 = shalt.err (!%p1247_p1)
}
  0x22   : > { %s1251_s9 = scalar_lea.vmem %s1528_s18, 384  ;;  %s1428_s13 = smov [#allocation5]  }
  0x23   : > { %p1252_p2 = scmp.ne.s32.totalorder %s1528_s18, %s1251_s9  ;;  %s1256_s14 = sshll.u32 %s1428_s13, 4  ;;  %s1257_s14 = int_to_ptr.vmem [resolvable:$false] %s1256_s14 }
  0x24   : > { %s1258_s15 = scalar_lea.vmem %s1257_s14, 768  ;;  %p1259_p6 = scmp.lt.s32.totalorder %s1528_s18, %s1257_s14 }
  0x25   : > { %p1254_p3 = pnand %p1252_p2, %p1536_p7  ;;  %p1260_p8 = scmp.lt.s32.totalorder %s1258_s15, %s1251_s9 }
  0x27   : > { %p1255_p4 = pneg %p1254_p3  ;;  %p1261_p10 = por %p1260_p8, %p1259_p6 }
  0x29   : > { %p1262_p11 = pnand %p1261_p10, %p1255_p4 }
  0x2b   : > { %1265 = shalt.err (!%p1262_p11)
}
  0x2c   : > { %s1429_s17 = smov 128   ;;  %s1430_s20 = smov 8  }
  0x2d   : > { %1147 = dma.hbm_to_vmem [thread:$0]  (!%p1518_p5), %s1526_s16, 384, %s1528_s18, %s1530_s19, %s1429_s17, %s1429_s17, %s1430_s20  }
  0x2e   : > { %s1561_s22 = sadd.s32 4294967295, %s1426_s27   ;;  %p108_p12 = scmp.ne.s32.totalorder %s1418_s25, %s1414_s24 }
  0x2f   : > { %p1849_p9 = scmp.eq.s32.totalorder %s1561_s22, 0  ;;  %p996_p13 = scmp.ge.s32.totalorder %s1426_s27, 1 }
  0x30   : > { %p218_p0 = scmp.lt.s32.totalorder %s1426_s27, 4  ;;  %s1431_s18 = smov [#allocation2]  }
  0x31   : > { %p1571_p2 = por %p1849_p9, %p108_p12  ;;  %s233_s29 = sshll.u32 %s1431_s18, 4  ;;  %s1579_s29 = int_to_ptr.vmem [resolvable:$true] %s233_s29 }
  0x32   : > { %p1575_p3 = pnand %p996_p13, %p218_p0  ;;  %s1856_s24 = sshll.u32 %s1515_s10, 7 }
  0x33   : > { %s1864_s23 = scalar_select %p1571_p2, 1, 0 }
  0x34   : > { %s1865_s16 = scalar_select %p1575_p3, 1, 0 }
  0x35   : > { %p1140_p4 = pneg %p1575_p3  ;;  %s1857_s30 = sshll.u32 %s1426_s27, 11 }
  0x36   : > { %s1596_s14 = scalar_lea.hbm %s1844_s4, %s1857_s30  ;;  %s275_s15 = scalar_lea.vmem [#allocation7], %s1856_s24 }
  0x37   : > { %p1587_p6 = pnand %p1140_p4, %p1849_p9  ;;  %s282_s17 = sshll.u32 %s275_s15, 4  ;;  %s1600_s17 = int_to_ptr.vmem [resolvable:$true] %s282_s17 }
  0x38   : > { %s1266_s3 = scalar_lea.hbm %s1841_s1, 192 }
  0x39   : > { %p1267_p8 = scmp.ne.s32.totalorder %s1841_s1, %s1266_s3  ;;  %p1268_p10 = pneg %p1587_p6 }
  0x3a   : > { %p1273_p13 = scmp.lt.u32.totalorder %s1266_s3, %s1841_s1 }
  0x3b   : > { %p1269_p11 = pnand %p1268_p10, %p1267_p8 }
  0x3d   : > { %p1270_p12 = pneg %p1269_p11 }
  0x3f   : > { %p1275_p0 = pnand %p1273_p13, %p1270_p12 }
  0x41   : > { %1278 = shalt.err (!%p1275_p0)
}
  0x42   : > { %s1279_s15 = scalar_lea.vmem %s1579_s29, 192  ;;  %p1287_p2 = scmp.lt.s32.totalorder %s1579_s29, %s1579_s29 }
  0x43   : > { %p1280_p4 = scmp.ne.s32.totalorder %s1579_s29, %s1279_s15  ;;  %p1288_p3 = scmp.lt.s32.totalorder %s1279_s15, %s1279_s15 }
  0x45   : > { %p1282_p1 = pnand %p1280_p4, %p1268_p10  ;;  %p1289_p5 = por %p1288_p3, %p1287_p2 }
  0x47   : > { %p1283_p9 = pneg %p1282_p1 }
  0x49   : > { %p1290_p7 = pnand %p1289_p5, %p1283_p9 }
  0x4b   : > { %1293 = shalt.err (!%p1290_p7)
}
  0x4c   : > { %s1432_s26 = smov 64   ;;  %s1433_s3 = smov 4  }
  0x4d   : > { %1143 = dma.hbm_to_vmem [thread:$0]  (!%p1587_p6), %s1841_s1, 192, %s1579_s29, [#allocation3], %s1432_s26, %s1432_s26, %s1433_s3  }
  0x4e   : > { %s1294_s18 = scalar_lea.hbm %s1596_s14, 2048  ;;  %p1867_p7 = scmp.ne.s32.totalorder %s1863_s21, 0 }
  0x4f   : > { %p1295_p5 = scmp.ne.s32.totalorder %s1596_s14, %s1294_s18  ;;  %s1299_s15 = scalar_lea.hbm %s1844_s4, 6144 }
  0x50   : > { %p1300_p2 = scmp.lt.u32.totalorder %s1596_s14, %s1844_s4  ;;  %p1301_p3 = scmp.lt.u32.totalorder %s1299_s15, %s1294_s18 }
  0x51   : > { %p1297_p9 = pnand %p1295_p5, %p1867_p7  ;;  %p1303_p10 = scmp.lt.u32.totalorder %s1294_s18, %s1596_s14 }
  0x52   : > { %p1302_p8 = por %p1301_p3, %p1300_p2 }
  0x53   : > { %p1298_p1 = pneg %p1297_p9 }
  0x54   : > { %p1304_p11 = por %p1303_p10, %p1302_p8 }
  0x56   : > { %p1305_p12 = pnand %p1304_p11, %p1298_p1 }
  0x58   : > { %1308 = shalt.err (!%p1305_p12)
}
  0x59   : > { %s1309_s29 = scalar_lea.vmem %s1600_s17, 2048  ;;  %s1434_s11 = smov [#allocation7]  }
  0x5a   : > { %p1310_p6 = scmp.ne.s32.totalorder %s1600_s17, %s1309_s29  ;;  %s1314_s8 = sshll.u32 %s1434_s11, 4  ;;  %s1315_s8 = int_to_ptr.vmem [resolvable:$false] %s1314_s8 }
  0x5b   : > { %s1316_s24 = scalar_lea.vmem %s1315_s8, 4096  ;;  %p1317_p4 = scmp.lt.s32.totalorder %s1600_s17, %s1315_s8 }
  0x5c   : > { %p1312_p13 = pnand %p1310_p6, %p1867_p7  ;;  %p1318_p5 = scmp.lt.s32.totalorder %s1316_s24, %s1309_s29 }
  0x5e   : > { %p1313_p0 = pneg %p1312_p13  ;;  %p1319_p9 = por %p1318_p5, %p1317_p4 }
  0x60   : > { %p1320_p2 = pnand %p1319_p9, %p1313_p0 }
  0x62   : > { %1323 = shalt.err (!%p1320_p2)
}
  0x63   : > { %p1868_p1 = scmp.ne.s32.totalorder %s1861_s12, 0  ;;  %s1869_s30 = sshll.u32 %s1426_s27, 11 }
  0x64   : > { %s1656_s9 = scalar_lea.hbm %s1845_s5, %s1869_s30  ;;  %s1870_s13 = sshll.u32 %s1515_s10, 7 }
  0x65   : > { %1150 = dma.hbm_to_vmem [thread:$0]  (!%p1868_p1), %s1596_s14, 2048, %s1600_s17, %s1530_s19, %s1432_s26, %s1432_s26, %s1433_s3  }
  0x66   : > { %s296_s15 = scalar_lea.vmem [#allocation8], %s1870_s13  ;;  %s293_s11 = scalar_lea.sflag [#allocation9], %s1515_s10 }
  0x67   : > { %s303_s29 = sshll.u32 %s296_s15, 4  ;;  %s1324_s8 = scalar_lea.hbm %s1656_s9, 2048  ;;  %s1660_s29 = int_to_ptr.vmem [resolvable:$true] %s303_s29 }
  0x68   : > { %p1325_p3 = scmp.ne.s32.totalorder %s1656_s9, %s1324_s8  ;;  %s1329_s14 = scalar_lea.hbm %s1845_s5, 6144 }
  0x69   : > { %p1330_p11 = scmp.lt.u32.totalorder %s1656_s9, %s1845_s5  ;;  %p1331_p12 = scmp.lt.u32.totalorder %s1329_s14, %s1324_s8 }
  0x6a   : > { %p1327_p8 = pnand %p1325_p3, %p1867_p7  ;;  %p1333_p13 = scmp.lt.u32.totalorder %s1324_s8, %s1656_s9 }
  0x6b   : > { %p1332_p6 = por %p1331_p12, %p1330_p11 }
  0x6c   : > { %p1328_p10 = pneg %p1327_p8 }
  0x6d   : > { %p1334_p0 = por %p1333_p13, %p1332_p6 }
  0x6f   : > { %p1335_p4 = pnand %p1334_p0, %p1328_p10 }
  0x71   : > { %1338 = shalt.err (!%p1335_p4)
}
  0x72   : > { %s1339_s30 = scalar_lea.vmem %s1660_s29, 2048  ;;  %s1435_s20 = smov [#allocation8]  }
  0x73   : > { %p1340_p5 = scmp.ne.s32.totalorder %s1660_s29, %s1339_s30  ;;  %s1344_s18 = sshll.u32 %s1435_s20, 4  ;;  %s1345_s18 = int_to_ptr.vmem [resolvable:$false] %s1344_s18 }
  0x74   : > { %s1346_s13 = scalar_lea.vmem %s1345_s18, 4096  ;;  %p1347_p3 = scmp.lt.s32.totalorder %s1660_s29, %s1345_s18 }
  0x75   : > { %p1342_p9 = pnand %p1340_p5, %p1867_p7  ;;  %p1348_p8 = scmp.lt.s32.totalorder %s1346_s13, %s1339_s30 }
  0x77   : > { %p1343_p2 = pneg %p1342_p9  ;;  %p1349_p11 = por %p1348_p8, %p1347_p3 }
  0x79   : > { %p1350_p12 = pnand %p1349_p11, %p1343_p2 }
  0x7b   : > { %1353 = shalt.err (!%p1350_p12)
}
  0x7c   : > { %1153 = dma.hbm_to_vmem [thread:$0]  (!%p1868_p1), %s1656_s9, 2048, %s1660_s29, %s293_s11, %s1432_s26, %s1432_s26, %s1433_s3  }
  0x7d   : > { %p1871_p7 = scmp.ne.s32.totalorder %s1865_s16, 0 }
  0x7e   : > { %p1872_p10 = scmp.eq.s32.totalorder (!%p1871_p7), %s1561_s22, 0 }
  0x7f   : > { %321 = sbr.rel (%p1871_p7) target bundleno = 847 (0x34f), region = 48 }
  0x86   : > { %1397 = dma.done.wait (%p1872_p10), [#allocation3], 192   ;;  %p1873_p6 = pmov %p1872_p10 }
  0x87   : > { %s327_s12 = sand.u32 1, %s1561_s22   ;;  %s329_s21 = sand.u32 1, %s1418_s25  }
  0x88   : > { %1399 = vsyncadd (%p1873_p6), [#allocation3], 4294967104  ;;  %s1125_s15 = smul.u32 24, %s329_s21  ;;  %s328_s8 = scalar_lea.sflag [#allocation6], %s327_s12 }
  0x89   : > { %p1874_p13 = scmp.ne.s32.totalorder %s1864_s23, 0 }
  0x8a   : > { %s1697_s10 = scalar_lea.vmem [#allocation5], %s1125_s15 }
  0x8b   : > { %1401 = dma.done.wait (%p1874_p13), %s328_s8, 2432  }
  0x8c   : > { %1403 = vsyncadd (%p1874_p13), %s328_s8, 4294964864  ;;  %s1008_s16 = sshll.u32 %s329_s21, 7  ;;  %s346_s3 = scalar_lea.sflag [#allocation9], %s329_s21 }
  0x8d   : > { %s1703_s26 = scalar_lea.vmem [#allocation7], %s1008_s16  ;;  %s1705_s9 = scalar_lea.vmem [#allocation8], %s1008_s16 }
  0x8e   : > { %1405 = dma.done.wait (%p1874_p13), %s346_s3, 2048  }
  0x8f   : > { %1407 = vsyncadd (%p1874_p13), %s346_s3, 4294965248  ;;  %p388_p1 = scmp.lt.s32.totalorder %s1561_s22, 2  ;;  %p1875_p0 = scmp.ne.s32.totalorder %s1561_s22, 0 }
  0x90   : > { %v396_v0 = vld [vmem:[%s1840_s0] sm:$0xff] (!%p1875_p0)  ;;  %v397_v1 = vld [vmem:[%s1840_s0 + $0x8] sm:$0xff] (!%p1875_p0)  ;;  %v398_v2 = vld [vmem:[%s1840_s0 + $0x10] sm:$0xff] (!%p1875_p0) }
  0x91   : > { %s1713_s29 = scalar_select %p388_p1, %s1561_s22, 2 }
  0x92   : > { %395 = sbr.rel (%p1875_p0) target bundleno = 153 (0x99), region = 68  ;;  %399 = vst [vmem:[#allocation10] sm:$0xff] (!%p1875_p0), %v396_v0  ;;  %400 = vst [vmem:[#allocation10 + $0x8] sm:$0xff] (!%p1875_p0), %v397_v1 }
  0x93   : > { %s390_s19 = scalar_lea.vmem %s1846_s6, %s1713_s29  ;;  %401 = vst [vmem:[#allocation10 + $0x10] sm:$0xff] (!%p1875_p0), %v398_v2 }
  0x99 PF: > { %v1730_v3 = vld [vmem:[#allocation10] sm:$0xff]  ;;  %v1732_v4 = vld [vmem:[#allocation10 + $0x8] sm:$0xff]  ;;  %vm421_vm0 = vcmask 195584   ;;  %v1436_v9 = vmov 0   ;;  %vm428_vm1 = vcmask 1043456   ;;  %v407_v12 = vld [vmem:[%s1842_s2 + $0x10] sm:$0xff] }
  0x9a   : > { %v1734_v5 = vld [vmem:[#allocation10 + $0x10] sm:$0xff]  ;;  %v1738_v6 = vpack.c.bf16 %v1732_v4, %v1730_v3  ;;  %v1202_v8 = vld [vmem:[#allocation2] sm:$0xff]   ;;  %1200 = vset.pattern.permute.xlu0 %v1436_v9  ;;  %1201 = vset.pattern.permute.xlu1 %v1436_v9  ;;  %v1203_v15 = vld [vmem:[#allocation2 + $0x8] ss:$0 sps:$4 sm:$0xff]   ;;  %p1157_p4 = scmp.eq.s32.totalorder %s1561_s22, 2 }
  0x9b   : > { %v1742_v7 = vpack.c.bf16 %v1734_v5, %v1734_v5  ;;  %v405_v10 = vld [vmem:[%s1842_s2] sm:$0xff]  ;;  %1118 = vmatprep.mubr.msk.bf16.mxu0 %vm421_vm0, %v1202_v8  ;;  %v406_v11 = vld [vmem:[%s1842_s2 + $0x8] sm:$0xff]  ;;  %492 = vperm.xlu1 %1201, %v407_v12   ;;  %v1210_v21 = vld [vmem:[%s1703_s26 + $0x58] sm:$0xff]  }
  0x9c   : > { %1114 = vmatprep.subr.bf16.mxu0 %v1738_v6  ;;  %482 = vperm.xlu0 %1200, %v405_v10   ;;  %v1204_v13 = vld [vmem:[%s1703_s26 + $0x40] sm:$0xff]   ;;  %v1206_v17 = vld [vmem:[%s1703_s26 + $0x48] sm:$0xff]   ;;  %v1208_v19 = vld [vmem:[%s1703_s26 + $0x50] sm:$0xff]  }
  0x9d   : > { %1115 = vmatpush3.bf16.msra.mxu0 %v1738_v6  ;;  %v430_v14 = vsel %vm428_vm1, %v1742_v7, 0  ;;  %v1205_v16 = vld [vmem:[%s1703_s26] sm:$0xff]   ;;  %1058 = vmatprep.subr.bf16.mxu1 %v1204_v13  ;;  %v1207_v18 = vld [vmem:[%s1703_s26 + $0x8] sm:$0xff]   ;;  %v1209_v20 = vld [vmem:[%s1703_s26 + $0x10] sm:$0xff]  }
  0x9e   : > { %1122 = vmatprep.subr.msk.bf16.mxu0 %vm428_vm1, %v1742_v7  ;;  %1059 = vmatpush3.bf16.msra.mxu1 %v1205_v16  ;;  %v1211_v22 = vld [vmem:[%s1703_s26 + $0x18] sm:$0xff]   ;;  %v1212_v23 = vld [vmem:[%s1703_s26 + $0x60] sm:$0xff]   ;;  %v1214_v25 = vld [vmem:[%s1703_s26 + $0x68] sm:$0xff]  }
  0x9f   : > { %1060 = vmatprep.subr.bf16.mxu1 %v1206_v17  ;;  %v1213_v24 = vld [vmem:[%s1703_s26 + $0x20] sm:$0xff]   ;;  %v1215_v26 = vld [vmem:[%s1703_s26 + $0x28] sm:$0xff]   ;;  %v1216_v27 = vld [vmem:[%s1703_s26 + $0x70] sm:$0xff]  }
  0xa0   : > { %487 = vperm.xlu0 %1200, %v406_v11   ;;  %v1217_v28 = vld [vmem:[%s1703_s26 + $0x30] sm:$0xff]   ;;  %v1218_v29 = vld [vmem:[%s1703_s26 + $0x78] sm:$0xff]   ;;  %v1220_v31 = vld [vmem:[%s1705_s9 + $0x40] sm:$0xff]  }
  0xa1   : > { %1117 = vmatpush3.bf16.msra.mxu0 %v430_v14  ;;  %v1219_v30 = vld [vmem:[%s1703_s26 + $0x38] sm:$0xff]   ;;  %v1221_v32 = vld [vmem:[%s1705_s9] sm:$0xff]   ;;  %v1222_v33 = vld [vmem:[%s1705_s9 + $0x48] sm:$0xff]  }
  0xa2   : > { %1061 = vmatpush3.bf16.msra.mxu1 %v1207_v18  ;;  %1086 = vmatprep.subr.bf16.mxu0 %v1220_v31  ;;  %v1223_v34 = vld [vmem:[%s1705_s9 + $0x8] sm:$0xff]   ;;  %v1224_v35 = vld [vmem:[%s1705_s9 + $0x50] sm:$0xff]   ;;  %v1226_v37 = vld [vmem:[%s1705_s9 + $0x58] sm:$0xff]  }
  0xa3   : > { %1062 = vmatprep.subr.bf16.mxu1 %v1208_v19  ;;  %v1225_v36 = vld [vmem:[%s1705_s9 + $0x10] sm:$0xff]   ;;  %v1227_v38 = vld [vmem:[%s1705_s9 + $0x18] sm:$0xff]   ;;  %v1228_v39 = vld [vmem:[%s1705_s9 + $0x60] sm:$0xff]  }
  0xa4   : > { %1119 = vmatmul.mubr.msk.bf16.vlgmr.msra.gmra.mrb[0].mxu0 %vm421_vm0, %v1203_v15  ;;  %v1229_v40 = vld [vmem:[%s1705_s9 + $0x20] sm:$0xff]   ;;  %v1230_v41 = vld [vmem:[%s1705_s9 + $0x68] sm:$0xff]   ;;  %v1232_v57 = vld [vmem:[%s1705_s9 + $0x70] sm:$0xff]  }
  0xa5   : > { %1087 = vmatpush3.bf16.msra.mxu0 %v1221_v32  ;;  %v1231_v56 = vld [vmem:[%s1705_s9 + $0x28] sm:$0xff]   ;;  %v1233_v58 = vld [vmem:[%s1705_s9 + $0x30] sm:$0xff]   ;;  %v1234_v59 = vld [vmem:[%s1705_s9 + $0x78] sm:$0xff]  }
  0xa6   : > { %1063 = vmatpush3.bf16.msra.mxu1 %v1209_v20  ;;  %1088 = vmatprep.subr.bf16.mxu0 %v1222_v33  ;;  %v1235_v60 = vld [vmem:[%s1705_s9 + $0x38] sm:$0xff]   ;;  %v534_v1 = vld [vmem:[%s1697_s10] sm:$0xff]  ;;  %v1031_v19 = vld [vmem:[%s390_s19] ss:$0 sm:$0xff] }
  0xa7   : > { %1064 = vmatprep.subr.bf16.mxu1 %v1210_v21  ;;  %v535_v2 = vld [vmem:[%s1697_s10 + $0x8] sm:$0xff]  ;;  %v536_v11 = vld [vmem:[%s1697_s10 + $0x10] sm:$0xff]  ;;  %s1437_s10 = smov [#allocation10]  }
  0xa8   : > { %s878_s3 = sshll.u32 %s1437_s10, 4  ;;  %s879_s3 = int_to_ptr.vmem [resolvable:$true] %s878_s3 }
  0xa9   : > { %1089 = vmatpush3.bf16.msra.mxu0 %v1223_v34  ;;  %s1354_s9 = scalar_lea.vmem %s879_s3, 384  ;;  %p1361_p3 = scmp.lt.s32.totalorder %s879_s3, %s879_s3 }
  0xaa   : > { %1065 = vmatpush3.bf16.msra.mxu1 %v1211_v22  ;;  %1090 = vmatprep.subr.bf16.mxu0 %v1224_v35  ;;  %p1355_p5 = scmp.ne.s32.totalorder %s879_s3, %s1354_s9  ;;  %p1362_p8 = scmp.lt.s32.totalorder %s1354_s9, %s1354_s9 }
  0xab   : > { %1066 = vmatprep.subr.bf16.mxu1 %v1212_v23 }
  0xac   : > { %p1356_p9 = pnand %p1355_p5, %p1157_p4  ;;  %p1363_p11 = por %p1362_p8, %p1361_p3 }
  0xad   : > { %1091 = vmatpush3.bf16.msra.mxu0 %v1225_v36 }
  0xae   : > { %1067 = vmatpush3.bf16.msra.mxu1 %v1213_v24  ;;  %1092 = vmatprep.subr.bf16.mxu0 %v1226_v37  ;;  %p1357_p2 = pneg %p1356_p9 }
  0xaf   : > { %1068 = vmatprep.subr.bf16.mxu1 %v1214_v25 }
  0xb0   : > { %p1364_p12 = pnand %p1363_p11, %p1357_p2 }
  0xb1   : > { %1093 = vmatpush3.bf16.msra.mxu0 %v1227_v38 }
  0xb2   : > { %1069 = vmatpush3.bf16.msra.mxu1 %v1215_v26  ;;  %1094 = vmatprep.subr.bf16.mxu0 %v1228_v39 }
  0xb3   : > { %1070 = vmatprep.subr.bf16.mxu1 %v1216_v27 }
  0xb5   : > { %1095 = vmatpush3.bf16.msra.mxu0 %v1229_v40 }
  0xb6   : > { %1071 = vmatpush3.bf16.msra.mxu1 %v1217_v28  ;;  %1096 = vmatprep.subr.bf16.mxu0 %v1230_v41 }
  0xb7   : > { %1072 = vmatprep.subr.bf16.mxu1 %v1218_v29 }
  0xb9   : > { %1097 = vmatpush3.bf16.msra.mxu0 %v1231_v56 }
  0xba   : > { %1073 = vmatpush3.bf16.msra.mxu1 %v1219_v30  ;;  %1098 = vmatprep.subr.bf16.mxu0 %v1232_v57 }
  0xbd   : > { %1099 = vmatpush3.bf16.msra.mxu0 %v1233_v58 }
  0xbe   : > { %1100 = vmatprep.subr.bf16.mxu0 %v1234_v59 }
  0xc1   : > { %1101 = vmatpush3.bf16.msra.mxu0 %v1235_v60 }
 0x11a   : > { %v493_v51 = vpop.permute.xlu1 %492 }
 0x11b   : > { %v483_v42 = vpop.permute.xlu0 %482  ;;  %v497_v54 = vmul.f32 %v493_v51, %v1734_v5 }
 0x11c   : > { %v495_v45 = vmul.f32 %v483_v42, %v1730_v3 }
 0x11d   : > { %v499_v55 = vpack.c.bf16 %v497_v54, %v497_v54 }
 0x11f   : > { %v488_v43 = vpop.permute.xlu0 %487 }
 0x120   : > { %v496_v46 = vmul.f32 %v488_v43, %v1732_v4 }
 0x122   : > { %v498_v52 = vpack.c.bf16 %v496_v46, %v495_v45 }
 0x177   : > { %v1120_v44 = vpop.f32.mrb[0].mxu0 }
 0x178   : > { %v466_v47 = vpop.f32.mrb[1].mxu0  ;;  %v501_v53 = vpack.c.bf16 %v1120_v44, %v1120_v44 }
 0x179   : > { %v1121_v48 = vpop.f32.mrb[2].mxu0 }
 0x17a   : > { %v469_v49 = vpop.f32.mrb[3].mxu0 }
 0x17b   : > { %v500_v50 = vpack.c.bf16 %v469_v49, %v466_v47 }
 0x17d   : > { %665 = vmatprep.mubr.bf16.mxu1 %v500_v50 }
 0x17e   : > { %666 = vmatmul.mubr.bf16.vlgmr.msra.gmra.mrb[0].mxu1 %v498_v52 }
 0x17f   : > { %673 = vmatprep.mubr.bf16.mxu1 %v501_v53 }
 0x186   : > { %674 = vmatmul.mubr.bf16.gmra.mrb[4].mxu1 %v499_v55 }
 0x251   : > { %v1074_v61 = vpop.f32.mrb[0].mxu1 }
 0x252   : > { %v1075_v62 = vpop.f32.mrb[1].mxu1 }
 0x253   : > { %v1076_v63 = vadd.f32 %v1075_v62, %v1074_v61  ;;  %v1077_v0 = vpop.f32.mrb[2].mxu1 }
 0x254   : > { %v1078_v3 = vpop.f32.mrb[3].mxu1 }
 0x255   : > { %v1079_v4 = vadd.f32 %v1078_v3, %v1077_v0  ;;  %v668_v5 = vadd.f32 %v1076_v63, %v534_v1 }
 0x257   : > { %v671_v8 = vadd.f32 %v1079_v4, %v535_v2 }
 0x259   : > { %v1080_v9 = vpop.f32.mrb[4].mxu1  ;;  %v681_v10 = vpack.c.bf16 %v671_v8, %v668_v5 }
 0x25a   : > { %v1081_v12 = vpop.f32.mrb[5].mxu1 }
 0x25b   : > { %v1082_v13 = vadd.f32 %v1081_v12, %v1080_v9  ;;  %v1083_v14 = vpop.f32.mrb[6].mxu1  ;;  %850 = vmatprep.mubr.bf16.mxu0 %v681_v10 }
 0x25c   : > { %v1084_v15 = vpop.f32.mrb[7].mxu1  ;;  %851 = vmatmul.mubr.bf16.vlgmr.msra.gmra.mrb[4].mxu0 %v1738_v6 }
 0x25d   : > { %v676_v16 = vadd.f32 %v1082_v13, %v536_v11 }
 0x25f   : > { %v682_v17 = vpack.c.bf16 %v676_v16, %v676_v16 }
 0x261   : > { %858 = vmatprep.mubr.bf16.mxu0 %v682_v17 }
 0x264   : > { %859 = vmatmul.mubr.bf16.gmra.mrb[8].mxu0 %v1742_v7 }
 0x32f   : > { %v1102_v18 = vpop.f32.mrb[4].mxu0 }
 0x330   : > { %v1103_v20 = vpop.f32.mrb[5].mxu0 }
 0x331   : > { %v1104_v21 = vadd.f32 %v1103_v20, %v1102_v18  ;;  %v1105_v22 = vpop.f32.mrb[6].mxu0 }
 0x332   : > { %v1106_v23 = vpop.f32.mrb[7].mxu0 }
 0x333   : > { %v853_v24 = vadd.f32 %v1104_v21, %v1031_v19  ;;  %v1107_v25 = vadd.f32 %v1106_v23, %v1105_v22 }
 0x335   : > { %v866_v26 = vmax.f32 %v853_v24, 0.0  ;;  %v856_v6 = vadd.f32 %v1107_v25, %v1031_v19 }
 0x337   : > { %869 = vst [vmem:[#allocation10] sm:$0xff] %v866_v26  ;;  %v867_v27 = vmax.f32 %v856_v6, 0.0  ;;  %v1108_v28 = vpop.f32.mrb[8].mxu0 }
 0x338   : > { %v1109_v7 = vpop.f32.mrb[9].mxu0 }
 0x339   : > { %870 = vst [vmem:[#allocation10 + $0x8] sm:$0xff] %v867_v27  ;;  %v1110_v29 = vadd.f32 %v1109_v7, %v1108_v28  ;;  %v1111_v30 = vpop.f32.mrb[10].mxu0 }
 0x33a   : > { %v1112_v31 = vpop.f32.mrb[11].mxu0 }
 0x33b   : > { %v861_v32 = vadd.f32 %v1110_v29, %v1031_v19 }
 0x33d   : > { %v868_v33 = vmax.f32 %v861_v32, 0.0 }
 0x33f   : > { %871 = vst [vmem:[#allocation10 + $0x10] sm:$0xff] %v868_v33 }
 0x340   : > { %1367 = shalt.err (!%p1364_p12)
}
 0x341   : > { %s1368_s27 = scalar_lea.hbm %s1847_s7, 384 }
 0x342   : > { %p1369_p7 = scmp.ne.s32.totalorder %s1847_s7, %s1368_s27  ;;  %p1374_p13 = scmp.lt.u32.totalorder %s1368_s27, %s1847_s7 }
 0x344   : > { %p1370_p10 = pnand %p1369_p7, %p1157_p4 }
 0x346   : > { %p1371_p6 = pneg %p1370_p10 }
 0x348   : > { %p1376_p1 = pnand %p1374_p13, %p1371_p6 }
 0x34a   : > { %1379 = shalt.err (!%p1376_p1)
}
 0x34b   : > { %s1438_s23 = smov 128   ;;  %s1439_s30 = smov 8  }
 0x34c   : > { %1137 = dma.vmem_to_hbm [thread:$0]  (%p1157_p4), %s879_s3, 384, %s1847_s7, [#allocation4], %s1438_s23, %s1438_s23, %s1439_s30  }
 0x34d   : > { %1409 = dma.done.wait (%p1157_p4), [#allocation4], 384  }
 0x34e   : > { %1411 = vsyncadd (%p1157_p4), [#allocation4], 4294966912 }
 0x34f PF: > { %s1876_s13 = sld [smem:[#allocation15_spill]]  ;;  %s1877_s26 = sld [smem:[#allocation16_spill]] }
 0x350   : > { %p22_p0 = scmp.ge.s32.totalorder %s1501_s28, 5   ;;  %s1878_s24 = smov %s1418_s25 }
 0x351   : > { %s1880_s27 = smov %s1501_s28 }
 0x352   :  { %24 = sbr.rel (!%p22_p0) target bundleno = 9 (0x9), region = 121 }
 0x355   : > { %s1879_s25 = smov %s1876_s13 }
 0x359   :  { %894 = vsyncpa [#allocation3], 1 }
 0x35a   :  { %896 = vsyncpa [#allocation3 + $0x1], 1 }
 0x35b   :  { %897 = vsyncpa [#allocation6], 1 }
 0x35c   :  { %899 = vsyncpa [#allocation6 + $0x1], 1 }
 0x35d   :  { %900 = vsyncpa [#allocation9], 1 }
 0x35e   :  { %902 = vsyncpa [#allocation9 + $0x1], 1 }
 0x35f   :  { %903 = vsyncpa [#allocation4], 1 }
 0x360   :  { %905 = vsyncpa [#allocation4 + $0x1], 1 }

// kernel: tpu_custom_call.1
= control target key start
LH: loop header
LB: loop body
LE: loop exit
PB: predicated region body
PF: predicated region fallthrough
CT: control target
= control target key end

     0   :  { %s1840_s0 = inlined_call_operand.vmem [shape: f32[24,128], index: 0, kind: input, shape index: {}]   ;;  %s1841_s1 = inlined_call_operand.hbm [shape: bf16[24,24], index: 1, kind: input, shape index: {}]   ;;  %s1842_s2 = inlined_call_operand.vmem [shape: f32[24,1], index: 2, kind: input, shape index: {}]   ;;  %s1843_s3 = inlined_call_operand.hbm [shape: f32[3,24,128], index: 3, kind: input, shape index: {}]   ;;  %s1844_s4 = inlined_call_operand.hbm [shape: bf16[3,256,128], index: 4, kind: input, shape index: {}]   ;;  %s1845_s5 = inlined_call_operand.hbm [shape: bf16[3,256,128], index: 5, kind: input, shape index: {}]   ;;  %s1846_s6 = inlined_call_operand.vmem [shape: f32[3,1,128], index: 6, kind: input, shape index: {}]   ;;  %s1847_s7 = inlined_call_operand.hbm [shape: f32[24,128], index: 7, kind: output, shape index: {}]  }
   0x1   :  { %1858 = sst [smem:[#allocation17_spill]] %s1843_s3 }
   0x2   :  { %12 = vsyncpa [#allocation3], 0 }
   0x3   :  { %13 = vsyncpa [#allocation6], 0 }
   0x4   :  { %15 = vsyncpa [#allocation6 + $0x1], 0 }
   0x5   :  { %16 = vsyncpa [#allocation9], 0 }
   0x6   :  { %18 = vsyncpa [#allocation9 + $0x1], 0 }
   0x7   :  { %19 = vsyncpa [#allocation4], 0  ;;  %s1480_s24 = smov 0   ;;  %s1482_s25 = smov 0  }
   0x8   :  { %s1484_s26 = smov 0   ;;  %s1486_s27 = smov 0  }
   0x9 LB: > { %1859 = sst [smem:[#allocation15_spill]] %s1422_s26  ;;  %s1501_s28 = sadd.s32 1, %s1426_s27   ;;  %s1426_s27 = sphi %s1486_s27, %s1880_s27   ;;  %s1422_s26 = sphi %s1484_s26, %s1877_s26   ;;  %s1418_s25 = sphi %s1482_s25, %s1879_s25   ;;  %s1414_s24 = sphi %s1480_s24, %s1878_s24  }
   0xa   : > { %s95_s29 = sadd.s32 1, %s1422_s26  ;;  %s92_s30 = ssub.s32 %s1426_s27, %s1501_s28 }
   0xb   : > { %p102_p0 = scmp.ne.s32.totalorder %s1422_s26, %s1418_s25  ;;  %p93_p1 = scmp.eq.s32.totalorder %s92_s30, 0 }
   0xc   : > { %p103_p2 = scmp.eq.s32.totalorder %s1426_s27, 0  ;;  %p1155_p3 = scmp.lt.s32.totalorder %s1426_s27, 3 }
   0xd   : > { %s1511_s8 = scalar_select %p93_p1, %s1422_s26, %s95_s29  }
   0xe   : > { %p104_p4 = por %p103_p2, %p102_p0  ;;  %s250_s9 = sand.u32 1, %s1426_s27  }
   0xf   : > { %1860 = sst [smem:[#allocation16_spill]] %s1511_s8  ;;  %s1515_s10 = sand.u32 1, %s1422_s26  }
  0x10   : > { %s1123_s11 = smul.u32 24, %s1515_s10  ;;  %p1518_p5 = pnand %p1155_p3, %p104_p4 }
  0x11   : > { %s1124_s13 = smul.u32 384, %s1426_s27  ;;  %s1862_s3 = sld [smem:[#allocation17_spill]] }
  0x12   : > { %s1861_s12 = scalar_select %p1518_p5, 1, 0 }
  0x13   : > { %s254_s17 = scalar_lea.vmem [#allocation5], %s1123_s11  ;;  %s1530_s19 = scalar_lea.sflag [#allocation6], %s250_s9 }
  0x14   : > { %s261_s18 = sshll.u32 %s254_s17, 4  ;;  %p1536_p7 = pneg %p1518_p5  ;;  %s1528_s18 = int_to_ptr.vmem [resolvable:$true] %s261_s18 }
  0x16   : > { %s1863_s21 = scalar_select %p1536_p7, 1, 0 }
  0x17   : > { %s1526_s16 = scalar_lea.hbm %s1862_s3, %s1124_s13  ;;  %s1241_s29 = scalar_lea.hbm %s1862_s3, 1152 }
  0x18   : > { %s1236_s20 = scalar_lea.hbm %s1526_s16, 384  ;;  %p1242_p10 = scmp.lt.u32.totalorder %s1526_s16, %s1862_s3 }
  0x19   : > { %p1237_p6 = scmp.ne.s32.totalorder %s1526_s16, %s1236_s20  ;;  %p1243_p11 = scmp.lt.u32.totalorder %s1241_s29, %s1236_s20 }
  0x1a   : > { %p1245_p13 = scmp.lt.u32.totalorder %s1236_s20, %s1526_s16 }
  0x1b   : > { %p1239_p8 = pnand %p1536_p7, %p1237_p6  ;;  %p1244_p12 = por %p1243_p11, %p1242_p10 }
  0x1d   : > { %p1240_p9 = pneg %p1239_p8  ;;  %p1246_p0 = por %p1245_p13, %p1244_p12 }
  0x1f   : > { %p1247_p1 = pnand %p1246_p0, %p1240_p9 }
  0x21   : > { %1250 = shalt.err (!%p1247_p1)
}
  0x22   : > { %s1251_s9 = scalar_lea.vmem %s1528_s18, 384  ;;  %s1428_s13 = smov [#allocation5]  }
  0x23   : > { %p1252_p2 = scmp.ne.s32.totalorder %s1528_s18, %s1251_s9  ;;  %s1256_s14 = sshll.u32 %s1428_s13, 4  ;;  %s1257_s14 = int_to_ptr.vmem [resolvable:$false] %s1256_s14 }
  0x24   : > { %s1258_s15 = scalar_lea.vmem %s1257_s14, 768  ;;  %p1259_p6 = scmp.lt.s32.totalorder %s1528_s18, %s1257_s14 }
  0x25   : > { %p1254_p3 = pnand %p1252_p2, %p1536_p7  ;;  %p1260_p8 = scmp.lt.s32.totalorder %s1258_s15, %s1251_s9 }
  0x27   : > { %p1255_p4 = pneg %p1254_p3  ;;  %p1261_p10 = por %p1260_p8, %p1259_p6 }
  0x29   : > { %p1262_p11 = pnand %p1261_p10, %p1255_p4 }
  0x2b   : > { %1265 = shalt.err (!%p1262_p11)
}
  0x2c   : > { %s1429_s17 = smov 128   ;;  %s1430_s20 = smov 8  }
  0x2d   : > { %1147 = dma.hbm_to_vmem [thread:$0]  (!%p1518_p5), %s1526_s16, 384, %s1528_s18, %s1530_s19, %s1429_s17, %s1429_s17, %s1430_s20  }
  0x2e   : > { %s1561_s22 = sadd.s32 4294967295, %s1426_s27   ;;  %p108_p12 = scmp.ne.s32.totalorder %s1418_s25, %s1414_s24 }
  0x2f   : > { %p1849_p9 = scmp.eq.s32.totalorder %s1561_s22, 0  ;;  %p996_p13 = scmp.ge.s32.totalorder %s1426_s27, 1 }
  0x30   : > { %p218_p0 = scmp.lt.s32.totalorder %s1426_s27, 4  ;;  %s1431_s18 = smov [#allocation2]  }
  0x31   : > { %p1571_p2 = por %p1849_p9, %p108_p12  ;;  %s233_s29 = sshll.u32 %s1431_s18, 4  ;;  %s1579_s29 = int_to_ptr.vmem [resolvable:$true] %s233_s29 }
  0x32   : > { %p1575_p3 = pnand %p996_p13, %p218_p0  ;;  %s1856_s24 = sshll.u32 %s1515_s10, 7 }
  0x33   : > { %s1864_s23 = scalar_select %p1571_p2, 1, 0 }
  0x34   : > { %s1865_s16 = scalar_select %p1575_p3, 1, 0 }
  0x35   : > { %p1140_p4 = pneg %p1575_p3  ;;  %s1857_s30 = sshll.u32 %s1426_s27, 11 }
  0x36   : > { %s1596_s14 = scalar_lea.hbm %s1844_s4, %s1857_s30  ;;  %s275_s15 = scalar_lea.vmem [#allocation7], %s1856_s24 }
  0x37   : > { %p1587_p6 = pnand %p1140_p4, %p1849_p9  ;;  %s282_s17 = sshll.u32 %s275_s15, 4  ;;  %s1600_s17 = int_to_ptr.vmem [resolvable:$true] %s282_s17 }
  0x38   : > { %s1266_s3 = scalar_lea.hbm %s1841_s1, 192 }
  0x39   : > { %p1267_p8 = scmp.ne.s32.totalorder %s1841_s1, %s1266_s3  ;;  %p1268_p10 = pneg %p1587_p6 }
  0x3a   : > { %p1273_p13 = scmp.lt.u32.totalorder %s1266_s3, %s1841_s1 }
  0x3b   : > { %p1269_p11 = pnand %p1268_p10, %p1267_p8 }
  0x3d   : > { %p1270_p12 = pneg %p1269_p11 }
  0x3f   : > { %p1275_p0 = pnand %p1273_p13, %p1270_p12 }
  0x41   : > { %1278 = shalt.err (!%p1275_p0)
}
  0x42   : > { %s1279_s15 = scalar_lea.vmem %s1579_s29, 192  ;;  %p1287_p2 = scmp.lt.s32.totalorder %s1579_s29, %s1579_s29 }
  0x43   : > { %p1280_p4 = scmp.ne.s32.totalorder %s1579_s29, %s1279_s15  ;;  %p1288_p3 = scmp.lt.s32.totalorder %s1279_s15, %s1279_s15 }
  0x45   : > { %p1282_p1 = pnand %p1280_p4, %p1268_p10  ;;  %p1289_p5 = por %p1288_p3, %p1287_p2 }
  0x47   : > { %p1283_p9 = pneg %p1282_p1 }
  0x49   : > { %p1290_p7 = pnand %p1289_p5, %p1283_p9 }
  0x4b   : > { %1293 = shalt.err (!%p1290_p7)
}
  0x4c   : > { %s1432_s26 = smov 64   ;;  %s1433_s3 = smov 4  }
  0x4d   : > { %1143 = dma.hbm_to_vmem [thread:$0]  (!%p1587_p6), %s1841_s1, 192, %s1579_s29, [#allocation3], %s1432_s26, %s1432_s26, %s1433_s3  }
  0x4e   : > { %s1294_s18 = scalar_lea.hbm %s1596_s14, 2048  ;;  %p1867_p7 = scmp.ne.s32.totalorder %s1863_s21, 0 }
  0x4f   : > { %p1295_p5 = scmp.ne.s32.totalorder %s1596_s14, %s1294_s18  ;;  %s1299_s15 = scalar_lea.hbm %s1844_s4, 6144 }
  0x50   : > { %p1300_p2 = scmp.lt.u32.totalorder %s1596_s14, %s1844_s4  ;;  %p1301_p3 = scmp.lt.u32.totalorder %s1299_s15, %s1294_s18 }
  0x51   : > { %p1297_p9 = pnand %p1295_p5, %p1867_p7  ;;  %p1303_p10 = scmp.lt.u32.totalorder %s1294_s18, %s1596_s14 }
  0x52   : > { %p1302_p8 = por %p1301_p3, %p1300_p2 }
  0x53   : > { %p1298_p1 = pneg %p1297_p9 }
  0x54   : > { %p1304_p11 = por %p1303_p10, %p1302_p8 }
  0x56   : > { %p1305_p12 = pnand %p1304_p11, %p1298_p1 }
  0x58   : > { %1308 = shalt.err (!%p1305_p12)
}
  0x59   : > { %s1309_s29 = scalar_lea.vmem %s1600_s17, 2048  ;;  %s1434_s11 = smov [#allocation7]  }
  0x5a   : > { %p1310_p6 = scmp.ne.s32.totalorder %s1600_s17, %s1309_s29  ;;  %s1314_s8 = sshll.u32 %s1434_s11, 4  ;;  %s1315_s8 = int_to_ptr.vmem [resolvable:$false] %s1314_s8 }
  0x5b   : > { %s1316_s24 = scalar_lea.vmem %s1315_s8, 4096  ;;  %p1317_p4 = scmp.lt.s32.totalorder %s1600_s17, %s1315_s8 }
  0x5c   : > { %p1312_p13 = pnand %p1310_p6, %p1867_p7  ;;  %p1318_p5 = scmp.lt.s32.totalorder %s1316_s24, %s1309_s29 }
  0x5e   : > { %p1313_p0 = pneg %p1312_p13  ;;  %p1319_p9 = por %p1318_p5, %p1317_p4 }
  0x60   : > { %p1320_p2 = pnand %p1319_p9, %p1313_p0 }
  0x62   : > { %1323 = shalt.err (!%p1320_p2)
}
  0x63   : > { %p1868_p1 = scmp.ne.s32.totalorder %s1861_s12, 0  ;;  %s1869_s30 = sshll.u32 %s1426_s27, 11 }
  0x64   : > { %s1656_s9 = scalar_lea.hbm %s1845_s5, %s1869_s30  ;;  %s1870_s13 = sshll.u32 %s1515_s10, 7 }
  0x65   : > { %1150 = dma.hbm_to_vmem [thread:$0]  (!%p1868_p1), %s1596_s14, 2048, %s1600_s17, %s1530_s19, %s1432_s26, %s1432_s26, %s1433_s3  }
  0x66   : > { %s296_s15 = scalar_lea.vmem [#allocation8], %s1870_s13  ;;  %s293_s11 = scalar_lea.sflag [#allocation9], %s1515_s10 }
  0x67   : > { %s303_s29 = sshll.u32 %s296_s15, 4  ;;  %s1324_s8 = scalar_lea.hbm %s1656_s9, 2048  ;;  %s1660_s29 = int_to_ptr.vmem [resolvable:$true] %s303_s29 }
  0x68   : > { %p1325_p3 = scmp.ne.s32.totalorder %s1656_s9, %s1324_s8  ;;  %s1329_s14 = scalar_lea.hbm %s1845_s5, 6144 }
  0x69   : > { %p1330_p11 = scmp.lt.u32.totalorder %s1656_s9, %s1845_s5  ;;  %p1331_p12 = scmp.lt.u32.totalorder %s1329_s14, %s1324_s8 }
  0x6a   : > { %p1327_p8 = pnand %p1325_p3, %p1867_p7  ;;  %p1333_p13 = scmp.lt.u32.totalorder %s1324_s8, %s1656_s9 }
  0x6b   : > { %p1332_p6 = por %p1331_p12, %p1330_p11 }
  0x6c   : > { %p1328_p10 = pneg %p1327_p8 }
  0x6d   : > { %p1334_p0 = por %p1333_p13, %p1332_p6 }
  0x6f   : > { %p1335_p4 = pnand %p1334_p0, %p1328_p10 }
  0x71   : > { %1338 = shalt.err (!%p1335_p4)
}
  0x72   : > { %s1339_s30 = scalar_lea.vmem %s1660_s29, 2048  ;;  %s1435_s20 = smov [#allocation8]  }
  0x73   : > { %p1340_p5 = scmp.ne.s32.totalorder %s1660_s29, %s1339_s30  ;;  %s1344_s18 = sshll.u32 %s1435_s20, 4  ;;  %s1345_s18 = int_to_ptr.vmem [resolvable:$false] %s1344_s18 }
  0x74   : > { %s1346_s13 = scalar_lea.vmem %s1345_s18, 4096  ;;  %p1347_p3 = scmp.lt.s32.totalorder %s1660_s29, %s1345_s18 }
  0x75   : > { %p1342_p9 = pnand %p1340_p5, %p1867_p7  ;;  %p1348_p8 = scmp.lt.s32.totalorder %s1346_s13, %s1339_s30 }
  0x77   : > { %p1343_p2 = pneg %p1342_p9  ;;  %p1349_p11 = por %p1348_p8, %p1347_p3 }
  0x79   : > { %p1350_p12 = pnand %p1349_p11, %p1343_p2 }
  0x7b   : > { %1353 = shalt.err (!%p1350_p12)
}
  0x7c   : > { %1153 = dma.hbm_to_vmem [thread:$0]  (!%p1868_p1), %s1656_s9, 2048, %s1660_s29, %s293_s11, %s1432_s26, %s1432_s26, %s1433_s3  }
  0x7d   : > { %p1871_p7 = scmp.ne.s32.totalorder %s1865_s16, 0 }
  0x7e   : > { %p1872_p10 = scmp.eq.s32.totalorder (!%p1871_p7), %s1561_s22, 0 }
  0x7f   : > { %321 = sbr.rel (%p1871_p7) target bundleno = 847 (0x34f), region = 48 }
  0x86   : > { %1397 = dma.done.wait (%p1872_p10), [#allocation3], 192   ;;  %p1873_p6 = pmov %p1872_p10 }
  0x87   : > { %s327_s12 = sand.u32 1, %s1561_s22   ;;  %s329_s21 = sand.u32 1, %s1418_s25  }
  0x88   : > { %1399 = vsyncadd (%p1873_p6), [#allocation3], 4294967104  ;;  %s1125_s15 = smul.u32 24, %s329_s21  ;;  %s328_s8 = scalar_lea.sflag [#allocation6], %s327_s12 }
  0x89   : > { %p1874_p13 = scmp.ne.s32.totalorder %s1864_s23, 0 }
  0x8a   : > { %s1697_s10 = scalar_lea.vmem [#allocation5], %s1125_s15 }
  0x8b   : > { %1401 = dma.done.wait (%p1874_p13), %s328_s8, 2432  }
  0x8c   : > { %1403 = vsyncadd (%p1874_p13), %s328_s8, 4294964864  ;;  %s1008_s16 = sshll.u32 %s329_s21, 7  ;;  %s346_s3 = scalar_lea.sflag [#allocation9], %s329_s21 }
  0x8d   : > { %s1703_s26 = scalar_lea.vmem [#allocation7], %s1008_s16  ;;  %s1705_s9 = scalar_lea.vmem [#allocation8], %s1008_s16 }
  0x8e   : > { %1405 = dma.done.wait (%p1874_p13), %s346_s3, 2048  }
  0x8f   : > { %1407 = vsyncadd (%p1874_p13), %s346_s3, 4294965248  ;;  %p388_p1 = scmp.lt.s32.totalorder %s1561_s22, 2  ;;  %p1875_p0 = scmp.ne.s32.totalorder %s1561_s22, 0 }
  0x90   : > { %v396_v0 = vld [vmem:[%s1840_s0] sm:$0xff] (!%p1875_p0)  ;;  %v397_v1 = vld [vmem:[%s1840_s0 + $0x8] sm:$0xff] (!%p1875_p0)  ;;  %v398_v2 = vld [vmem:[%s1840_s0 + $0x10] sm:$0xff] (!%p1875_p0) }
  0x91   : > { %s1713_s29 = scalar_select %p388_p1, %s1561_s22, 2 }
  0x92   : > { %395 = sbr.rel (%p1875_p0) target bundleno = 153 (0x99), region = 68  ;;  %399 = vst [vmem:[#allocation10] sm:$0xff] (!%p1875_p0), %v396_v0  ;;  %400 = vst [vmem:[#allocation10 + $0x8] sm:$0xff] (!%p1875_p0), %v397_v1 }
  0x93   : > { %s390_s19 = scalar_lea.vmem %s1846_s6, %s1713_s29  ;;  %401 = vst [vmem:[#allocation10 + $0x10] sm:$0xff] (!%p1875_p0), %v398_v2 }
  0x99 PF: > { %v1730_v3 = vld [vmem:[#allocation10] sm:$0xff]  ;;  %v1732_v4 = vld [vmem:[#allocation10 + $0x8] sm:$0xff]  ;;  %vm421_vm0 = vcmask 195584   ;;  %v1436_v9 = vmov 0   ;;  %vm428_vm1 = vcmask 1043456   ;;  %v407_v12 = vld [vmem:[%s1842_s2 + $0x10] sm:$0xff] }
  0x9a   : > { %v1734_v5 = vld [vmem:[#allocation10 + $0x10] sm:$0xff]  ;;  %v1738_v6 = vpack.c.bf16 %v1732_v4, %v1730_v3  ;;  %v1202_v8 = vld [vmem:[#allocation2] sm:$0xff]   ;;  %1200 = vset.pattern.permute.xlu0 %v1436_v9  ;;  %1201 = vset.pattern.permute.xlu1 %v1436_v9  ;;  %v1203_v15 = vld [vmem:[#allocation2 + $0x8] ss:$0 sps:$4 sm:$0xff]   ;;  %p1157_p4 = scmp.eq.s32.totalorder %s1561_s22, 2 }
  0x9b   : > { %v1742_v7 = vpack.c.bf16 %v1734_v5, %v1734_v5  ;;  %v405_v10 = vld [vmem:[%s1842_s2] sm:$0xff]  ;;  %1118 = vmatprep.mubr.msk.bf16.mxu0 %vm421_vm0, %v1202_v8  ;;  %v406_v11 = vld [vmem:[%s1842_s2 + $0x8] sm:$0xff]  ;;  %492 = vperm.xlu1 %1201, %v407_v12   ;;  %v1210_v21 = vld [vmem:[%s1703_s26 + $0x58] sm:$0xff]  }
  0x9c   : > { %1114 = vmatprep.subr.bf16.mxu0 %v1738_v6  ;;  %482 = vperm.xlu0 %1200, %v405_v10   ;;  %v1204_v13 = vld [vmem:[%s1703_s26 + $0x40] sm:$0xff]   ;;  %v1206_v17 = vld [vmem:[%s1703_s26 + $0x48] sm:$0xff]   ;;  %v1208_v19 = vld [vmem:[%s1703_s26 + $0x50] sm:$0xff]  }
  0x9d   : > { %1115 = vmatpush3.bf16.msra.mxu0 %v1738_v6  ;;  %v430_v14 = vsel %vm428_vm1, %v1742_v7, 0  ;;  %v1205_v16 = vld [vmem:[%s1703_s26] sm:$0xff]   ;;  %1058 = vmatprep.subr.bf16.mxu1 %v1204_v13  ;;  %v1207_v18 = vld [vmem:[%s1703_s26 + $0x8] sm:$0xff]   ;;  %v1209_v20 = vld [vmem:[%s1703_s26 + $0x10] sm:$0xff]  }
  0x9e   : > { %1122 = vmatprep.subr.msk.bf16.mxu0 %vm428_vm1, %v1742_v7  ;;  %1059 = vmatpush3.bf16.msra.mxu1 %v1205_v16  ;;  %v1211_v22 = vld [vmem:[%s1703_s26 + $0x18] sm:$0xff]   ;;  %v1212_v23 = vld [vmem:[%s1703_s26 + $0x60] sm:$0xff]   ;;  %v1214_v25 = vld [vmem:[%s1703_s26 + $0x68] sm:$0xff]  }
  0x9f   : > { %1060 = vmatprep.subr.bf16.mxu1 %v1206_v17  ;;  %v1213_v24 = vld [vmem:[%s1703_s26 + $0x20] sm:$0xff]   ;;  %v1215_v26 = vld [vmem:[%s1703_s26 + $0x28] sm:$0xff]   ;;  %v1216_v27 = vld [vmem:[%s1703_s26 + $0x70] sm:$0xff]  }
  0xa0   : > { %487 = vperm.xlu0 %1200, %v406_v11   ;;  %v1217_v28 = vld [vmem:[%s1703_s26 + $0x30] sm:$0xff]   ;;  %v1218_v29 = vld [vmem:[%s1703_s26 + $0x78] sm:$0xff]   ;;  %v1220_v31 = vld [vmem:[%s1705_s9 + $0x40] sm:$0xff]  }
  0xa1   : > { %1117 = vmatpush3.bf16.msra.mxu0 %v430_v14  ;;  %v1219_v30 = vld [vmem:[%s1703_s26 + $0x38] sm:$0xff]   ;;  %v1221_v32 = vld [vmem:[%s1705_s9] sm:$0xff]   ;;  %v1222_v33 = vld [vmem:[%s1705_s9 + $0x48] sm:$0xff]  }
  0xa2   : > { %1061 = vmatpush3.bf16.msra.mxu1 %v1207_v18  ;;  %1086 = vmatprep.subr.bf16.mxu0 %v1220_v31  ;;  %v1223_v34 = vld [vmem:[%s1705_s9 + $0x8] sm:$0xff]   ;;  %v1224_v35 = vld [vmem:[%s1705_s9 + $0x50] sm:$0xff]   ;;  %v1226_v37 = vld [vmem:[%s1705_s9 + $0x58] sm:$0xff]  }
  0xa3   : > { %1062 = vmatprep.subr.bf16.mxu1 %v1208_v19  ;;  %v1225_v36 = vld [vmem:[%s1705_s9 + $0x10] sm:$0xff]   ;;  %v1227_v38 = vld [vmem:[%s1705_s9 + $0x18] sm:$0xff]   ;;  %v1228_v39 = vld [vmem:[%s1705_s9 + $0x60] sm:$0xff]  }
  0xa4   : > { %1119 = vmatmul.mubr.msk.bf16.vlgmr.msra.gmra.mrb[0].mxu0 %vm421_vm0, %v1203_v15  ;;  %v1229_v40 = vld [vmem:[%s1705_s9 + $0x20] sm:$0xff]   ;;  %v1230_v41 = vld [vmem:[%s1705_s9 + $0x68] sm:$0xff]   ;;  %v1232_v57 = vld [vmem:[%s1705_s9 + $0x70] sm:$0xff]  }
  0xa5   : > { %1087 = vmatpush3.bf16.msra.mxu0 %v1221_v32  ;;  %v1231_v56 = vld [vmem:[%s1705_s9 + $0x28] sm:$0xff]   ;;  %v1233_v58 = vld [vmem:[%s1705_s9 + $0x30] sm:$0xff]   ;;  %v1234_v59 = vld [vmem:[%s1705_s9 + $0x78] sm:$0xff]  }
  0xa6   : > { %1063 = vmatpush3.bf16.msra.mxu1 %v1209_v20  ;;  %1088 = vmatprep.subr.bf16.mxu0 %v1222_v33  ;;  %v1235_v60 = vld [vmem:[%s1705_s9 + $0x38] sm:$0xff]   ;;  %v534_v1 = vld [vmem:[%s1697_s10] sm:$0xff]  ;;  %v1031_v19 = vld [vmem:[%s390_s19] ss:$0 sm:$0xff] }
  0xa7   : > { %1064 = vmatprep.subr.bf16.mxu1 %v1210_v21  ;;  %v535_v2 = vld [vmem:[%s1697_s10 + $0x8] sm:$0xff]  ;;  %v536_v11 = vld [vmem:[%s1697_s10 + $0x10] sm:$0xff]  ;;  %s1437_s10 = smov [#allocation10]  }
  0xa8   : > { %s878_s3 = sshll.u32 %s1437_s10, 4  ;;  %s879_s3 = int_to_ptr.vmem [resolvable:$true] %s878_s3 }
  0xa9   : > { %1089 = vmatpush3.bf16.msra.mxu0 %v1223_v34  ;;  %s1354_s9 = scalar_lea.vmem %s879_s3, 384  ;;  %p1361_p3 = scmp.lt.s32.totalorder %s879_s3, %s879_s3 }
  0xaa   : > { %1065 = vmatpush3.bf16.msra.mxu1 %v1211_v22  ;;  %1090 = vmatprep.subr.bf16.mxu0 %v1224_v35  ;;  %p1355_p5 = scmp.ne.s32.totalorder %s879_s3, %s1354_s9  ;;  %p1362_p8 = scmp.lt.s32.totalorder %s1354_s9, %s1354_s9 }
  0xab   : > { %1066 = vmatprep.subr.bf16.mxu1 %v1212_v23 }
  0xac   : > { %p1356_p9 = pnand %p1355_p5, %p1157_p4  ;;  %p1363_p11 = por %p1362_p8, %p1361_p3 }
  0xad   : > { %1091 = vmatpush3.bf16.msra.mxu0 %v1225_v36 }
  0xae   : > { %1067 = vmatpush3.bf16.msra.mxu1 %v1213_v24  ;;  %1092 = vmatprep.subr.bf16.mxu0 %v1226_v37  ;;  %p1357_p2 = pneg %p1356_p9 }
  0xaf   : > { %1068 = vmatprep.subr.bf16.mxu1 %v1214_v25 }
  0xb0   : > { %p1364_p12 = pnand %p1363_p11, %p1357_p2 }
  0xb1   : > { %1093 = vmatpush3.bf16.msra.mxu0 %v1227_v38 }
  0xb2   : > { %1069 = vmatpush3.bf16.msra.mxu1 %v1215_v26  ;;  %1094 = vmatprep.subr.bf16.mxu0 %v1228_v39 }
  0xb3   : > { %1070 = vmatprep.subr.bf16.mxu1 %v1216_v27 }
  0xb5   : > { %1095 = vmatpush3.bf16.msra.mxu0 %v1229_v40 }
  0xb6   : > { %1071 = vmatpush3.bf16.msra.mxu1 %v1217_v28  ;;  %1096 = vmatprep.subr.bf16.mxu0 %v1230_v41 }
  0xb7   : > { %1072 = vmatprep.subr.bf16.mxu1 %v1218_v29 }
  0xb9   : > { %1097 = vmatpush3.bf16.msra.mxu0 %v1231_v56 }
  0xba   : > { %1073 = vmatpush3.bf16.msra.mxu1 %v1219_v30  ;;  %1098 = vmatprep.subr.bf16.mxu0 %v1232_v57 }
  0xbd   : > { %1099 = vmatpush3.bf16.msra.mxu0 %v1233_v58 }
  0xbe   : > { %1100 = vmatprep.subr.bf16.mxu0 %v1234_v59 }
  0xc1   : > { %1101 = vmatpush3.bf16.msra.mxu0 %v1235_v60 }
 0x11a   : > { %v493_v51 = vpop.permute.xlu1 %492 }
 0x11b   : > { %v483_v42 = vpop.permute.xlu0 %482  ;;  %v497_v54 = vmul.f32 %v493_v51, %v1734_v5 }
 0x11c   : > { %v495_v45 = vmul.f32 %v483_v42, %v1730_v3 }
 0x11d   : > { %v499_v55 = vpack.c.bf16 %v497_v54, %v497_v54 }
 0x11f   : > { %v488_v43 = vpop.permute.xlu0 %487 }
 0x120   : > { %v496_v46 = vmul.f32 %v488_v43, %v1732_v4 }
 0x122   : > { %v498_v52 = vpack.c.bf16 %v496_v46, %v495_v45 }
 0x177   : > { %v1120_v44 = vpop.f32.mrb[0].mxu0 }
 0x178   : > { %v466_v47 = vpop.f32.mrb[1].mxu0  ;;  %v501_v53 = vpack.c.bf16 %v1120_v44, %v1120_v44 }
 0x179   : > { %v1121_v48 = vpop.f32.mrb[2].mxu0 }
 0x17a   : > { %v469_v49 = vpop.f32.mrb[3].mxu0 }
 0x17b   : > { %v500_v50 = vpack.c.bf16 %v469_v49, %v466_v47 }
 0x17d   : > { %665 = vmatprep.mubr.bf16.mxu1 %v500_v50 }
 0x17e   : > { %666 = vmatmul.mubr.bf16.vlgmr.msra.gmra.mrb[0].mxu1 %v498_v52 }
 0x17f   : > { %673 = vmatprep.mubr.bf16.mxu1 %v501_v53 }
 0x186   : > { %674 = vmatmul.mubr.bf16.gmra.mrb[4].mxu1 %v499_v55 }
 0x251   : > { %v1074_v61 = vpop.f32.mrb[0].mxu1 }
 0x252   : > { %v1075_v62 = vpop.f32.mrb[1].mxu1 }
 0x253   : > { %v1076_v63 = vadd.f32 %v1075_v62, %v1074_v61  ;;  %v1077_v0 = vpop.f32.mrb[2].mxu1 }
 0x254   : > { %v1078_v3 = vpop.f32.mrb[3].mxu1 }
 0x255   : > { %v1079_v4 = vadd.f32 %v1078_v3, %v1077_v0  ;;  %v668_v5 = vadd.f32 %v1076_v63, %v534_v1 }
 0x257   : > { %v671_v8 = vadd.f32 %v1079_v4, %v535_v2 }
 0x259   : > { %v1080_v9 = vpop.f32.mrb[4].mxu1  ;;  %v681_v10 = vpack.c.bf16 %v671_v8, %v668_v5 }
 0x25a   : > { %v1081_v12 = vpop.f32.mrb[5].mxu1 }
 0x25b   : > { %v1082_v13 = vadd.f32 %v1081_v12, %v1080_v9  ;;  %v1083_v14 = vpop.f32.mrb[6].mxu1  ;;  %850 = vmatprep.mubr.bf16.mxu0 %v681_v10 }
 0x25c   : > { %v1084_v15 = vpop.f32.mrb[7].mxu1  ;;  %851 = vmatmul.mubr.bf16.vlgmr.msra.gmra.mrb[4].mxu0 %v1738_v6 }
 0x25d   : > { %v676_v16 = vadd.f32 %v1082_v13, %v536_v11 }
 0x25f   : > { %v682_v17 = vpack.c.bf16 %v676_v16, %v676_v16 }
 0x261   : > { %858 = vmatprep.mubr.bf16.mxu0 %v682_v17 }
 0x264   : > { %859 = vmatmul.mubr.bf16.gmra.mrb[8].mxu0 %v1742_v7 }
 0x32f   : > { %v1102_v18 = vpop.f32.mrb[4].mxu0 }
 0x330   : > { %v1103_v20 = vpop.f32.mrb[5].mxu0 }
 0x331   : > { %v1104_v21 = vadd.f32 %v1103_v20, %v1102_v18  ;;  %v1105_v22 = vpop.f32.mrb[6].mxu0 }
 0x332   : > { %v1106_v23 = vpop.f32.mrb[7].mxu0 }
 0x333   : > { %v853_v24 = vadd.f32 %v1104_v21, %v1031_v19  ;;  %v1107_v25 = vadd.f32 %v1106_v23, %v1105_v22 }
 0x335   : > { %v866_v26 = vmax.f32 %v853_v24, 0.0  ;;  %v856_v6 = vadd.f32 %v1107_v25, %v1031_v19 }
 0x337   : > { %869 = vst [vmem:[#allocation10] sm:$0xff] %v866_v26  ;;  %v867_v27 = vmax.f32 %v856_v6, 0.0  ;;  %v1108_v28 = vpop.f32.mrb[8].mxu0 }
 0x338   : > { %v1109_v7 = vpop.f32.mrb[9].mxu0 }
 0x339   : > { %870 = vst [vmem:[#allocation10 + $0x8] sm:$0xff] %v867_v27  ;;  %v1110_v29 = vadd.f32 %v1109_v7, %v1108_v28  ;;  %v1111_v30 = vpop.f32.mrb[10].mxu0 }
 0x33a   : > { %v1112_v31 = vpop.f32.mrb[11].mxu0 }
 0x33b   : > { %v861_v32 = vadd.f32 %v1110_v29, %v1031_v19 }
 0x33d   : > { %v868_v33 = vmax.f32 %v861_v32, 0.0 }
 0x33f   : > { %871 = vst [vmem:[#allocation10 + $0x10] sm:$0xff] %v868_v33 }
 0x340   : > { %1367 = shalt.err (!%p1364_p12)
}
 0x341   : > { %s1368_s27 = scalar_lea.hbm %s1847_s7, 384 }
 0x342   : > { %p1369_p7 = scmp.ne.s32.totalorder %s1847_s7, %s1368_s27  ;;  %p1374_p13 = scmp.lt.u32.totalorder %s1368_s27, %s1847_s7 }
 0x344   : > { %p1370_p10 = pnand %p1369_p7, %p1157_p4 }
 0x346   : > { %p1371_p6 = pneg %p1370_p10 }
 0x348   : > { %p1376_p1 = pnand %p1374_p13, %p1371_p6 }
 0x34a   : > { %1379 = shalt.err (!%p1376_p1)
}
 0x34b   : > { %s1438_s23 = smov 128   ;;  %s1439_s30 = smov 8  }
 0x34c   : > { %1137 = dma.vmem_to_hbm [thread:$0]  (%p1157_p4), %s879_s3, 384, %s1847_s7, [#allocation4], %s1438_s23, %s1438_s23, %s1439_s30  }
 0x34d   : > { %1409 = dma.done.wait (%p1157_p4), [#allocation4], 384  }
 0x34e   : > { %1411 = vsyncadd (%p1157_p4), [#allocation4], 4294966912 }
 0x34f PF: > { %s1876_s13 = sld [smem:[#allocation15_spill]]  ;;  %s1877_s26 = sld [smem:[#allocation16_spill]] }
 0x350   : > { %p22_p0 = scmp.ge.s32.totalorder %s1501_s28, 5   ;;  %s1878_s24 = smov %s1418_s25 }
 0x351   : > { %s1880_s27 = smov %s1501_s28 }
 0x352   :  { %24 = sbr.rel (!%p22_p0) target bundleno = 9 (0x9), region = 121 }
 0x355   : > { %s1879_s25 = smov %s1876_s13 }
 0x359   :  { %894 = vsyncpa [#allocation3], 1 }
 0x35a   :  { %896 = vsyncpa [#allocation3 + $0x1], 1 }
 0x35b   :  { %897 = vsyncpa [#allocation6], 1 }
 0x35c   :  { %899 = vsyncpa [#allocation6 + $0x1], 1 }
 0x35d   :  { %900 = vsyncpa [#allocation9], 1 }
 0x35e   :  { %902 = vsyncpa [#allocation9 + $0x1], 1 }
 0x35f   :  { %903 = vsyncpa [#allocation4], 1 }
 0x360   :  { %905 = vsyncpa [#allocation4 + $0x1], 1 }

</bundles_post_ra>
